<compile_context>
chip_gen: v7x
topology: tpu7x:2x2x1
jax: 0.10.0
libtpu: 0.0.40
codegen_flags: <defaults>
</compile_context>

<pallas_src>
import functools

import jax
import jax.numpy as jnp
from jax.experimental import pallas as pl
from jax.experimental.pallas import tpu as pltpu


def _round_up(x, m):
    return (x + m - 1) // m * m


def _conv_bn_relu_kernel(x_ref, w_ref, b_ref, o_ref, *, TH, Wq, C_in, TC, KS):
    """Grid = (N, H // TH, Cout_p // TC).

    x_ref : (1, Hp*Wq, C_in)  bf16 zero-padded image, rows flattened as h*Wq + w;
                              constant block index across (i, j) -> resident in VMEM.
    w_ref : (KS*KS, C_in, TC) bf16 BN-scale-folded weights for this C_out tile.
    b_ref : (1, TC)           f32 folded BN bias for this C_out tile.
    o_ref : (1, TH*Wq, TC)    f32 output tile (columns >= W are garbage, wrapper slices).
    """
    i = pl.program_id(1)
    m = TH * Wq                           # flattened output rows in this tile
    halo = (KS - 1) * Wq + 8              # extra rows so every tap slice stays in bounds

    base = pl.multiple_of(i * m, 8)
    rows = x_ref[0, pl.ds(base, m + halo), :]          # one aligned load: (m + halo, C_in)

    acc = jnp.zeros((m, TC), jnp.float32)
    for dy in range(KS):
        for dx in range(KS):
            off = dy * Wq + dx
            # contiguous shifted view of the flattened rows (no 2-D strided window/reshape)
            tap = rows[off:off + m, :]
            acc = acc + jnp.dot(tap, w_ref[dy * KS + dx],
                                preferred_element_type=jnp.float32)

    y = jnp.maximum(acc + b_ref[...], 0.0)             # folded BN bias + ReLU
    o_ref[0] = y.astype(o_ref.dtype)


def conv_bn_relu(x_nchw, weight, gamma, beta, running_mean, running_var, eps=1e-5):
    """ConvBNLU forward. x_nchw: (N, C_in, H, W); weight: (C_out, C_in, KS, KS)."""
    N, C_in, H, W = x_nchw.shape
    C_out, C_in_w, KS, KS2 = weight.shape
    assert C_in_w == C_in and KS == KS2 and KS % 2 == 1
    pad = (KS - 1) // 2  # module defaults: ks=3, stride=1, padding=1, dilation=1, groups=1
    # TODO(synk): only stride=1, dilation=1, groups=1 (the ConvBNLU defaults) are supported.

    # ---- fold BN (inference) -> scale into weights, bias kept separately ----
    inv_std = 1.0 / jnp.sqrt(running_var.astype(jnp.float32) + eps)
    scale = gamma.astype(jnp.float32) * inv_std
    bias = beta.astype(jnp.float32) - running_mean.astype(jnp.float32) * scale

    # ---- layout: NCHW -> NHWC, zero pad, flatten rows, lane-dense (padded) C_out ----
    Cout_p = _round_up(C_out, 128)                     # lane-dense output channels
    TC = 256 if Cout_p % 256 == 0 else 128             # 256-wide N tiles when possible (v6e/v7x)
    Wq = _round_up(W + 2 * pad, 8)                     # padded width, multiple of 8 sublanes
    Hp = H + KS                                        # rows: `pad` above, KS - pad below

    x_nhwc = jnp.transpose(x_nchw, (0, 2, 3, 1))
    x_pad = jnp.pad(x_nhwc, ((0, 0), (pad, KS - pad), (pad, Wq - W - pad), (0, 0)))
    x_flat = x_pad.reshape(N, Hp * Wq, C_in).astype(jnp.bfloat16)
    # TODO(synk): the NCHW<->NHWC transposes and jnp.pad are extra HBM copies; keep the model
    # NHWC end-to-end and move the halo into an in-kernel DMA to eliminate them.

    w_hwio = jnp.transpose(weight, (2, 3, 1, 0)).astype(jnp.float32) * scale[None, None, None, :]
    w_hwio = jnp.pad(w_hwio, ((0, 0), (0, 0), (0, 0), (0, Cout_p - C_out)))
    w_taps = w_hwio.reshape(KS * KS, C_in, Cout_p).astype(jnp.bfloat16)

    bias_p = jnp.pad(bias, (0, Cout_p - C_out)).reshape(1, Cout_p)

    # ---- tiling / grid ----
    TH = H
    for cand in (128, 64, 32):                         # row tiles for large images
        if H % cand == 0:
            TH = cand
            break
    n_h = H // TH
    n_c = Cout_p // TC
    grid = (N, n_h, n_c)
    m = TH * Wq

    # ---- explicit VMEM budget (re-derived so it also fits v7x's 64 MiB) ----
    x_blk = Hp * Wq * C_in * 2
    w_blk = KS * KS * C_in * TC * 2
    o_blk = m * TC * 4
    scratch = (m + (KS - 1) * Wq + 8) * C_in * 4 + 3 * m * TC * 4
    vmem_limit = int(max(16 << 20,
                         min(2 * (x_blk + w_blk + o_blk) + scratch + (4 << 20), 48 << 20)))
    # TODO(synk): for very large H*W the resident full-image input block should become
    # halo'd row-tile DMAs (manual make_async_copy) to stay inside v7x's 64 MiB VMEM.

    kernel = functools.partial(_conv_bn_relu_kernel,
                               TH=TH, Wq=Wq, C_in=C_in, TC=TC, KS=KS)

    out_flat = pl.pallas_call(
        kernel,
        out_shape=jax.ShapeDtypeStruct((N, H * Wq, Cout_p), jnp.float32),
        grid_spec=pltpu.PrefetchScalarGridSpec(
            num_scalar_prefetch=0,
            grid=grid,
            in_specs=[
                # full padded image per batch; constant block index across (i, j) keeps it
                # resident in VMEM (no re-DMA across the h / C_out axes).
                pl.BlockSpec((1, Hp * Wq, C_in), lambda n, i, j: (n, 0, 0)),
                pl.BlockSpec((KS * KS, C_in, TC), lambda n, i, j: (0, 0, j)),
                pl.BlockSpec((1, TC), lambda n, i, j: (0, j)),
            ],
            out_specs=pl.BlockSpec((1, m, TC), lambda n, i, j: (n, i, j)),
        ),
        compiler_params=pltpu.CompilerParams(
            dimension_semantics=("parallel", "parallel", "parallel"),
            vmem_limit_bytes=vmem_limit),
    )(x_flat, w_taps, bias_p)

    out = out_flat.reshape(N, H, Wq, Cout_p)[:, :, :W, :C_out]
    return jnp.transpose(out, (0, 3, 1, 2))


def _reference(x, weight, gamma, beta, running_mean, running_var, eps=1e-5):
    """f32 reference with the same bf16-rounded operands the kernel feeds the MXU."""
    inv_std = 1.0 / jnp.sqrt(running_var + eps)
    scale = gamma * inv_std
    w_fold = weight * scale[:, None, None, None]
    xq = x.astype(jnp.bfloat16).astype(jnp.float32)
    wq = w_fold.astype(jnp.bfloat16).astype(jnp.float32)
    y = jax.lax.conv_general_dilated(
        xq, wq, window_strides=(1, 1), padding=((1, 1), (1, 1)),
        dimension_numbers=("NCHW", "OIHW", "NCHW"),
        precision=jax.lax.Precision.HIGHEST,
        preferred_element_type=jnp.float32)
    b = (beta - running_mean * scale)[None, :, None, None]
    return jnp.maximum(y + b, 0.0)


if __name__ == "__main__":
    key = jax.random.PRNGKey(0)
    k0, k1, k2, k3, k4, k5 = jax.random.split(key, 6)

    N, C_in, H, W = 2, 4, 16, 16
    C_out, KS = 8, 3

    x = jax.random.normal(k0, (N, C_in, H, W), dtype=jnp.float32)
    weight = jax.random.normal(k1, (C_out, C_in, KS, KS), dtype=jnp.float32) * 0.1
    gamma = jax.random.normal(k2, (C_out,), dtype=jnp.float32) * 0.1 + 1.0
    beta = jax.random.normal(k3, (C_out,), dtype=jnp.float32) * 0.1
    running_mean = jax.random.normal(k4, (C_out,), dtype=jnp.float32) * 0.1
    running_var = jnp.abs(jax.random.normal(k5, (C_out,), dtype=jnp.float32)) + 1.0

    out = conv_bn_relu(x, weight, gamma, beta, running_mean, running_var)
    out = jax.block_until_ready(out)

    ref = _reference(x, weight, gamma, beta, running_mean, running_var)
    assert out.shape == (N, C_out, H, W)
    max_err = jnp.max(jnp.abs(out - ref))
    assert jnp.allclose(out, ref, atol=2e-3, rtol=2e-3), f"mismatch vs reference (max {max_err})"

    print("KERNEL_OK")
</pallas_src>

<mosaic_0001>
module attributes {stable_mosaic.version = 11 : i64} {
  func.func @_conv_bn_relu_kernel(%arg0: i32, %arg1: i32, %arg2: i32, %arg3: memref<1x456x4xbf16, #tpu.memory_space<vmem>>, %arg4: memref<9x4x128xbf16, #tpu.memory_space<vmem>>, %arg5: memref<1x128xf32, #tpu.memory_space<vmem>>, %arg6: memref<1x384x128xf32, #tpu.memory_space<vmem>>) attributes {dimension_semantics = [#tpu.dimension_semantics<parallel>, #tpu.dimension_semantics<parallel>, #tpu.dimension_semantics<parallel>], iteration_bounds = array<i64: 2, 1, 1>, scalar_prefetch = 0 : i64, scratch_operands = 0 : i64, tpu.core_type = #tpu.core_type<tc>, window_params = [{transform_indices = @transform_0, window_bounds = array<i64: 1, 456, 4>}, {transform_indices = @transform_1, window_bounds = array<i64: 9, 4, 128>}, {transform_indices = @transform_2, window_bounds = array<i64: 1, 128>}, {transform_indices = @transform_3, window_bounds = array<i64: 1, 384, 128>}]} {
    %c384_i32 = arith.constant 384 : i32
    %0 = arith.muli %arg1, %c384_i32 : i32
    %1 = tpu.assume_multiple %0, 8 : i32
    %c0 = arith.constant 0 : index
    %2 = arith.index_cast %1 : i32 to index
    %c0_0 = arith.constant 0 : index
    %3 = vector.load %arg3[%c0, %2, %c0_0] : memref<1x456x4xbf16, #tpu.memory_space<vmem>>, vector<1x440x4xbf16>
    %4 = vector.shape_cast %3 : vector<1x440x4xbf16> to vector<440x4xbf16>
    %cst = arith.constant 0.000000e+00 : f32
    %5 = vector.broadcast %cst : f32 to vector<384x128xf32>
    %6 = vector.extract_strided_slice %4 {offsets = [0, 0], sizes = [384, 4], strides = [1, 1]} : vector<440x4xbf16> to vector<384x4xbf16>
    %c0_1 = arith.constant 0 : index
    %c0_2 = arith.constant 0 : index
    %c0_3 = arith.constant 0 : index
    %7 = vector.load %arg4[%c0_1, %c0_2, %c0_3] : memref<9x4x128xbf16, #tpu.memory_space<vmem>>, vector<1x4x128xbf16>
    %8 = vector.shape_cast %7 : vector<1x4x128xbf16> to vector<4x128xbf16>
    %cst_4 = arith.constant dense<0.000000e+00> : vector<384x128xf32>
    %9 = tpu.matmul %6, %8, %cst_4 {dimension_numbers = #tpu.dot_dimension_numbers<[1], [0], [0], [1], [0, 0, 1, 1], [], []>} : vector<384x4xbf16>, vector<4x128xbf16>, vector<384x128xf32> -> vector<384x128xf32>
    %10 = arith.addf %5, %9 : vector<384x128xf32>
    %11 = vector.extract_strided_slice %4 {offsets = [1, 0], sizes = [384, 4], strides = [1, 1]} : vector<440x4xbf16> to vector<384x4xbf16>
    %c1 = arith.constant 1 : index
    %c0_5 = arith.constant 0 : index
    %c0_6 = arith.constant 0 : index
    %12 = vector.load %arg4[%c1, %c0_5, %c0_6] : memref<9x4x128xbf16, #tpu.memory_space<vmem>>, vector<1x4x128xbf16>
    %13 = vector.shape_cast %12 : vector<1x4x128xbf16> to vector<4x128xbf16>
    %cst_7 = arith.constant dense<0.000000e+00> : vector<384x128xf32>
    %14 = tpu.matmul %11, %13, %cst_7 {dimension_numbers = #tpu.dot_dimension_numbers<[1], [0], [0], [1], [0, 0, 1, 1], [], []>} : vector<384x4xbf16>, vector<4x128xbf16>, vector<384x128xf32> -> vector<384x128xf32>
    %15 = arith.addf %10, %14 : vector<384x128xf32>
    %16 = vector.extract_strided_slice %4 {offsets = [2, 0], sizes = [384, 4], strides = [1, 1]} : vector<440x4xbf16> to vector<384x4xbf16>
    %c2 = arith.constant 2 : index
    %c0_8 = arith.constant 0 : index
    %c0_9 = arith.constant 0 : index
    %17 = vector.load %arg4[%c2, %c0_8, %c0_9] : memref<9x4x128xbf16, #tpu.memory_space<vmem>>, vector<1x4x128xbf16>
    %18 = vector.shape_cast %17 : vector<1x4x128xbf16> to vector<4x128xbf16>
    %cst_10 = arith.constant dense<0.000000e+00> : vector<384x128xf32>
    %19 = tpu.matmul %16, %18, %cst_10 {dimension_numbers = #tpu.dot_dimension_numbers<[1], [0], [0], [1], [0, 0, 1, 1], [], []>} : vector<384x4xbf16>, vector<4x128xbf16>, vector<384x128xf32> -> vector<384x128xf32>
    %20 = arith.addf %15, %19 : vector<384x128xf32>
    %21 = vector.extract_strided_slice %4 {offsets = [24, 0], sizes = [384, 4], strides = [1, 1]} : vector<440x4xbf16> to vector<384x4xbf16>
    %c3 = arith.constant 3 : index
    %c0_11 = arith.constant 0 : index
    %c0_12 = arith.constant 0 : index
    %22 = vector.load %arg4[%c3, %c0_11, %c0_12] : memref<9x4x128xbf16, #tpu.memory_space<vmem>>, vector<1x4x128xbf16>
    %23 = vector.shape_cast %22 : vector<1x4x128xbf16> to vector<4x128xbf16>
    %cst_13 = arith.constant dense<0.000000e+00> : vector<384x128xf32>
    %24 = tpu.matmul %21, %23, %cst_13 {dimension_numbers = #tpu.dot_dimension_numbers<[1], [0], [0], [1], [0, 0, 1, 1], [], []>} : vector<384x4xbf16>, vector<4x128xbf16>, vector<384x128xf32> -> vector<384x128xf32>
    %25 = arith.addf %20, %24 : vector<384x128xf32>
    %26 = vector.extract_strided_slice %4 {offsets = [25, 0], sizes = [384, 4], strides = [1, 1]} : vector<440x4xbf16> to vector<384x4xbf16>
    %c4 = arith.constant 4 : index
    %c0_14 = arith.constant 0 : index
    %c0_15 = arith.constant 0 : index
    %27 = vector.load %arg4[%c4, %c0_14, %c0_15] : memref<9x4x128xbf16, #tpu.memory_space<vmem>>, vector<1x4x128xbf16>
    %28 = vector.shape_cast %27 : vector<1x4x128xbf16> to vector<4x128xbf16>
    %cst_16 = arith.constant dense<0.000000e+00> : vector<384x128xf32>
    %29 = tpu.matmul %26, %28, %cst_16 {dimension_numbers = #tpu.dot_dimension_numbers<[1], [0], [0], [1], [0, 0, 1, 1], [], []>} : vector<384x4xbf16>, vector<4x128xbf16>, vector<384x128xf32> -> vector<384x128xf32>
    %30 = arith.addf %25, %29 : vector<384x128xf32>
    %31 = vector.extract_strided_slice %4 {offsets = [26, 0], sizes = [384, 4], strides = [1, 1]} : vector<440x4xbf16> to vector<384x4xbf16>
    %c5 = arith.constant 5 : index
    %c0_17 = arith.constant 0 : index
    %c0_18 = arith.constant 0 : index
    %32 = vector.load %arg4[%c5, %c0_17, %c0_18] : memref<9x4x128xbf16, #tpu.memory_space<vmem>>, vector<1x4x128xbf16>
    %33 = vector.shape_cast %32 : vector<1x4x128xbf16> to vector<4x128xbf16>
    %cst_19 = arith.constant dense<0.000000e+00> : vector<384x128xf32>
    %34 = tpu.matmul %31, %33, %cst_19 {dimension_numbers = #tpu.dot_dimension_numbers<[1], [0], [0], [1], [0, 0, 1, 1], [], []>} : vector<384x4xbf16>, vector<4x128xbf16>, vector<384x128xf32> -> vector<384x128xf32>
    %35 = arith.addf %30, %34 : vector<384x128xf32>
    %36 = vector.extract_strided_slice %4 {offsets = [48, 0], sizes = [384, 4], strides = [1, 1]} : vector<440x4xbf16> to vector<384x4xbf16>
    %c6 = arith.constant 6 : index
    %c0_20 = arith.constant 0 : index
    %c0_21 = arith.constant 0 : index
    %37 = vector.load %arg4[%c6, %c0_20, %c0_21] : memref<9x4x128xbf16, #tpu.memory_space<vmem>>, vector<1x4x128xbf16>
    %38 = vector.shape_cast %37 : vector<1x4x128xbf16> to vector<4x128xbf16>
    %cst_22 = arith.constant dense<0.000000e+00> : vector<384x128xf32>
    %39 = tpu.matmul %36, %38, %cst_22 {dimension_numbers = #tpu.dot_dimension_numbers<[1], [0], [0], [1], [0, 0, 1, 1], [], []>} : vector<384x4xbf16>, vector<4x128xbf16>, vector<384x128xf32> -> vector<384x128xf32>
    %40 = arith.addf %35, %39 : vector<384x128xf32>
    %41 = vector.extract_strided_slice %4 {offsets = [49, 0], sizes = [384, 4], strides = [1, 1]} : vector<440x4xbf16> to vector<384x4xbf16>
    %c7 = arith.constant 7 : index
    %c0_23 = arith.constant 0 : index
    %c0_24 = arith.constant 0 : index
    %42 = vector.load %arg4[%c7, %c0_23, %c0_24] : memref<9x4x128xbf16, #tpu.memory_space<vmem>>, vector<1x4x128xbf16>
    %43 = vector.shape_cast %42 : vector<1x4x128xbf16> to vector<4x128xbf16>
    %cst_25 = arith.constant dense<0.000000e+00> : vector<384x128xf32>
    %44 = tpu.matmul %41, %43, %cst_25 {dimension_numbers = #tpu.dot_dimension_numbers<[1], [0], [0], [1], [0, 0, 1, 1], [], []>} : vector<384x4xbf16>, vector<4x128xbf16>, vector<384x128xf32> -> vector<384x128xf32>
    %45 = arith.addf %40, %44 : vector<384x128xf32>
    %46 = vector.extract_strided_slice %4 {offsets = [50, 0], sizes = [384, 4], strides = [1, 1]} : vector<440x4xbf16> to vector<384x4xbf16>
    %c8 = arith.constant 8 : index
    %c0_26 = arith.constant 0 : index
    %c0_27 = arith.constant 0 : index
    %47 = vector.load %arg4[%c8, %c0_26, %c0_27] : memref<9x4x128xbf16, #tpu.memory_space<vmem>>, vector<1x4x128xbf16>
    %48 = vector.shape_cast %47 : vector<1x4x128xbf16> to vector<4x128xbf16>
    %cst_28 = arith.constant dense<0.000000e+00> : vector<384x128xf32>
    %49 = tpu.matmul %46, %48, %cst_28 {dimension_numbers = #tpu.dot_dimension_numbers<[1], [0], [0], [1], [0, 0, 1, 1], [], []>} : vector<384x4xbf16>, vector<4x128xbf16>, vector<384x128xf32> -> vector<384x128xf32>
    %50 = arith.addf %45, %49 : vector<384x128xf32>
    %c0_29 = arith.constant 0 : index
    %c0_30 = arith.constant 0 : index
    %51 = vector.load %arg5[%c0_29, %c0_30] : memref<1x128xf32, #tpu.memory_space<vmem>>, vector<1x128xf32>
    %52 = vector.broadcast %51 : vector<1x128xf32> to vector<384x128xf32>
    %53 = arith.addf %50, %52 : vector<384x128xf32>
    %cst_31 = arith.constant 0.000000e+00 : f32
    %54 = vector.broadcast %cst_31 : f32 to vector<384x128xf32>
    %55 = arith.maximumf %53, %54 : vector<384x128xf32>
    %c0_32 = arith.constant 0 : index
    %c0_33 = arith.constant 0 : index
    %c0_34 = arith.constant 0 : index
    %56 = vector.load %arg6[%c0_32, %c0_33, %c0_34] : memref<1x384x128xf32, #tpu.memory_space<vmem>>, vector<1x384x128xf32>
    %57 = vector.shape_cast %56 : vector<1x384x128xf32> to vector<384x128xf32>
    %58 = vector.shape_cast %55 : vector<384x128xf32> to vector<1x384x128xf32>
    tpu.vector_store %arg6[%c0_32, %c0_33, %c0_34], %58 {strides = array<i32>} : memref<1x384x128xf32, #tpu.memory_space<vmem>>, vector<1x384x128xf32>,
    return
  }
  func.func @transform_0(%arg0: i32, %arg1: i32, %arg2: i32) -> (i32, i32, i32) {
    %c0_i32 = arith.constant 0 : i32
    %c0_i32_0 = arith.constant 0 : i32
    %c0_i32_1 = arith.constant 0 : i32
    return %arg0, %c0_i32, %c0_i32_0 : i32, i32, i32
  }
  func.func @transform_1(%arg0: i32, %arg1: i32, %arg2: i32) -> (i32, i32, i32) {
    %c0_i32 = arith.constant 0 : i32
    %c0_i32_0 = arith.constant 0 : i32
    %c0_i32_1 = arith.constant 0 : i32
    return %c0_i32, %c0_i32_0, %arg2 : i32, i32, i32
  }
  func.func @transform_2(%arg0: i32, %arg1: i32, %arg2: i32) -> (i32, i32) {
    %c0_i32 = arith.constant 0 : i32
    %c0_i32_0 = arith.constant 0 : i32
    return %c0_i32, %arg2 : i32, i32
  }
  func.func @transform_3(%arg0: i32, %arg1: i32, %arg2: i32) -> (i32, i32, i32) {
    %c0_i32 = arith.constant 0 : i32
    return %arg0, %arg1, %arg2 : i32, i32, i32
  }
}

</mosaic_0001>

<bundles_post_ra>
// kernel: tpu_custom_call.1
= control target key start
LH: loop header
LB: loop body
LE: loop exit
PB: predicated region body
PF: predicated region fallthrough
CT: control target
= control target key end

     0   :  { %8 = vsyncpa [#allocation3], 0  ;;  %s6963_s0 = inlined_call_operand.vmem [shape: bf16[2,456,4], index: 0, kind: input, shape index: {}]   ;;  %s6964_s1 = inlined_call_operand.vmem [shape: bf16[9,4,128], index: 1, kind: input, shape index: {}]   ;;  %s6965_s2 = inlined_call_operand.vmem [shape: f32[1,128], index: 2, kind: input, shape index: {}]   ;;  %s6966_s3 = inlined_call_operand.hbm [shape: f32[2,384,128], index: 3, kind: output, shape index: {}]  }
   0x1   :  { %10 = vsyncpa [#allocation3 + $0x1], 0  ;;  %s5651_s12 = smov 0   ;;  %s5653_s13 = smov 0  }
   0x2   :  { %s5655_s14 = smov 0   ;;  %s5657_s15 = smov 0  }
   0x3   :  { %s5659_s16 = smov 0   ;;  %s5661_s17 = smov 0  }
   0x4 LB: > { %s4073_s18 = sadd.s32 4294967295, %s5626_s17   ;;  %s4074_s19 = sadd.s32 4294967294, %s5626_s17   ;;  %s5626_s17 = sphi %s5661_s17, %s16_s17   ;;  %s5622_s16 = sphi %s5659_s16, %s7071_s16   ;;  %s5618_s15 = sphi %s5657_s15, %s7070_s15   ;;  %s5614_s14 = sphi %s5655_s14, %s7069_s14   ;;  %s5610_s13 = sphi %s5653_s13, %s7068_s13   ;;  %s5606_s12 = sphi %s5651_s12, %s7067_s12  }
   0x5   : > { %s35_s20 = sadd.s32 1, %s5622_s16  ;;  %s124_s21 = sadd.s32 1, %s5614_s14 }
   0x6   : > { %p37_p0 = scmp.ge.s32.totalorder %s35_s20, 2  ;;  %p134_p1 = scmp.ne.s32.totalorder %s5614_s14, %s5610_s13 }
   0x7   : > { %p135_p2 = scmp.eq.s32.totalorder %s4073_s18, 1  ;;  %p140_p3 = scmp.ne.s32.totalorder %s5610_s13, %s5606_s12 }
   0x8   : > { %s7073_s20 = smov (%p37_p0, %s35_s20), 0  ;;  %p141_p5 = scmp.eq.s32.totalorder %s4074_s19, 1 }
   0x9   : > { %p5691_p4 = por %p135_p2, %p134_p1  ;;  %s117_s23 = ssub.s32 %s5622_s16, %s7073_s20 }
   0xa   : > { %p4079_p6 = scmp.ge.s32.totalorder %s5626_s17, 1  ;;  %p122_p7 = scmp.eq.s32.totalorder %s117_s23, 0 }
   0xb   : > { %p5698_p8 = por %p141_p5, %p140_p3  ;;  %p180_p9 = scmp.lt.s32.totalorder %s5626_s17, 3 }
   0xc   : > { %s5704_s25 = scalar_select %p122_p7, %s5614_s14, %s124_s21  }
   0xd   : > { %p181_p10 = pnand %p4079_p6, %p180_p9 }
   0xf   : > { %184 = sbr.rel (%p181_p10) target bundleno = 701 (0x2bd), region = 32 }
  0x16   : > { %v4081_v0 = vld [vmem:[%s6964_s1 + $0x2] sm:$0x3]  ;;  %vm681_vm0 = vcmask 1041408   ;;  %v5712_v1 = vld [vmem:[%s6964_s1 + $0x8] sm:$0x3]  ;;  %p211_p11 = scmp.lt.s32.totalorder %s5618_s15, 1 }
  0x17   : > { %7003 = vst [vmem:[#allocation5_spill] sm:$0xff] %v5712_v1  ;;  %5424 = vmatprep.subr.msk.bf16.mxu1 %vm681_vm0, %v4081_v0  ;;  %5428 = vmatprep.subr.msk.bf16.mxu0 %vm681_vm0, %v5712_v1  ;;  %v683_v2 = vsel %vm681_vm0, %v4081_v0, 0  ;;  %v5721_v3 = vsel %vm681_vm0, %v5712_v1, 0  ;;  %v285_v4 = vld [vmem:[%s6964_s1] sm:$0x3]  ;;  %vm608_vm2 = vcmask 31744  }
  0x18   : > { %7004 = vst [vmem:[#allocation6_spill] sm:$0xff] %v5721_v3  ;;  %4589 = vmatpush3.bf16.msra.mxu1 %v683_v2  ;;  %4789 = vmatpush3.bf16.msra.mxu0 %v5721_v3  ;;  %s212_s30 = scalar_select %p211_p11, %s5618_s15, 1  ;;  %v4255_v5 = vld [vmem:[%s6964_s1 + $0xa] sm:$0x3]  ;;  %vm411_vm1 = vsmask.f32 7424 }
  0x19   : > { %5425 = vmatprep.subr.msk.bf16.mxu1 %vm681_vm0, %v285_v4  ;;  %5430 = vmatprep.subr.msk.bf16.mxu0 %vm681_vm0, %v4255_v5  ;;  %v959_v6 = vsel %vm681_vm0, %v285_v4, 0  ;;  %v5746_v11 = vsel %vm681_vm0, %v4255_v5, 0  ;;  %v5790_v54 = vld [vmem:[%s6964_s1 + $0xc] sm:$0x3]  ;;  %v5800_v59 = vld [vmem:[%s6964_s1 + $0x4] sm:$0x3] }
  0x1a   : > { %s5435_s8 = smul.u32 228, %s212_s30  ;;  %vm1188_vm3 = vcmask 1046528   ;;  %s208_s5 = sand.u32 1, %s5610_s13  }
  0x1b   : > { %s5434_s6 = smul.u32 384, %s208_s5  ;;  %s5628_s26 = smov [#allocation2]  }
  0x1c   : > { %s5736_s11 = scalar_lea.vmem %s6963_s0, %s5435_s8  ;;  %s5436_s10 = smul.u32 6144, %s5618_s15 }
  0x1d   : > { %v232_v7 = vld [vmem:[%s5736_s11 + $0x8] sm:$0xf]  ;;  %v233_v8 = vld [vmem:[%s5736_s11 + $0xc] sm:$0xf]  ;;  %v5742_v9 = vld [vmem:[%s5736_s11] sm:$0xff]   ;;  %s6798_s9 = scalar_lea.vmem [#allocation2], %s5434_s6 }
  0x1e   : > { %v234_v10 = vld [vmem:[%s5736_s11 + $0x10] sm:$0xf]  ;;  %v5748_v12 = vcombine.low %v232_v7, %v233_v8  ;;  %v235_v13 = vld [vmem:[%s5736_s11 + $0x14] sm:$0xf]  ;;  %v236_v14 = vld [vmem:[%s5736_s11 + $0x18] sm:$0xf]  ;;  %s6908_s21 = scalar_lea.hbm %s6966_s3, %s5436_s10 }
  0x1f   : > { %v237_v15 = vld [vmem:[%s5736_s11 + $0x1c] sm:$0xf]  ;;  %v5753_v16 = vcombine.low %v233_v8, %v234_v10  ;;  %v413_v17 = vshrl.u32 %v5742_v9, 16  ;;  %v415_v18 = vshll.u32 %v5742_v9, 16  ;;  %v5757_v19 = vcombine.low %v234_v10, %v235_v13  ;;  %v238_v21 = vld [vmem:[%s5736_s11 + $0x20] sm:$0xf] }
  0x20   : > { %v5759_v20 = vcombine.low %v236_v14, %v237_v15  ;;  %v420_v22 = vshll.u32 %v5748_v12, 16  ;;  %v424_v23 = vshrl.u32 %v5748_v12, 16  ;;  %v5764_v24 = vcombine.low %v235_v13, %v236_v14  ;;  %v239_v30 = vld [vmem:[%s5736_s11 + $0x24] sm:$0xf]  ;;  %v240_v39 = vld [vmem:[%s5736_s11 + $0x28] sm:$0xf] }
  0x21   : > { %7005 = vst [vmem:[#allocation7_spill] sm:$0xff] %v5753_v16  ;;  %v1969_v25 = vshrl.u32 %v5753_v16, 16  ;;  %v417_v26 = vrot.slane %v415_v18, 1  ;;  %v1971_v27 = vshll.u32 %v5753_v16, 16  ;;  %v428_v28 = vshll.u32 %v5757_v19, 16  ;;  %s6917_s15 = scalar_lea.sflag [#allocation3], %s208_s5 }
  0x22   : > { %7006 = vst [vmem:[#allocation8_spill] sm:$0xff] %v5764_v24  ;;  %v5769_v29 = vcombine.low %v237_v15, %v238_v21  ;;  %v422_v31 = vrot.slane %v420_v22, 1  ;;  %v1975_v32 = vshll.u32 %v5764_v24, 16  ;;  %v1979_v33 = vshrl.u32 %v5764_v24, 16  ;;  %v241_v52 = vld [vmem:[%s5736_s11 + $0x2c] sm:$0xf] }
  0x23   : > { %v432_v34 = vshrl.u32 %v5757_v19, 16  ;;  %v418_v35 = vor.u32 %v417_v26, %v413_v17  ;;  %v1973_v36 = vrot.slane %v1971_v27, 1  ;;  %v430_v37 = vrot.slane %v428_v28, 1  ;;  %v242_v53 = vld [vmem:[%s5736_s11 + $0x30] sm:$0xf]  ;;  %s5552_s27 = sshll.u32 %s5628_s26, 4  ;;  %s5553_s27 = int_to_ptr.vmem [resolvable:$false] %s5552_s27 }
  0x24   : > { %7007 = vst [vmem:[#allocation9_spill] sm:$0xff] %v5769_v29  ;;  %v1982_v38 = vshll.u32 %v5769_v29, 16  ;;  %v426_v40 = vor.u32 %v424_v23, %v422_v31  ;;  %v1977_v41 = vrot.slane %v1975_v32, 1  ;;  %v436_v42 = vshll.u32 %v5759_v20, 16  ;;  %v243_v0 = vld [vmem:[%s5736_s11 + $0x34] sm:$0xf] }
  0x25   : > { %v5778_v43 = vcombine.low %v238_v21, %v239_v30  ;;  %v423_v44 = vsel %vm411_vm1, %v418_v35, %v422_v31  ;;  %v1974_v45 = vor.u32 %v1973_v36, %v1969_v25  ;;  %v434_v47 = vor.u32 %v432_v34, %v430_v37  ;;  %v244_v2 = vld [vmem:[%s5736_s11 + $0x38] sm:$0xf]  ;;  %v246_v22 = vld [vmem:[%s5736_s11 + $0x40] sm:$0xf]  ;;  %s5554_s28 = scalar_lea.vmem %s5553_s27, 12288 }
  0x26   : > { %v1984_v46 = vrot.slane %v1982_v38, 1  ;;  %4590 = vmatprep.mubr.msk.bf16.mxu1 %vm608_vm2, %v423_v44  ;;  %v1981_v48 = vor.u32 %v1979_v33, %v1977_v41  ;;  %v431_v49 = vsel %vm411_vm1, %v426_v40, %v430_v37  ;;  %v438_v50 = vrot.slane %v436_v42, 1  ;;  %v247_v37 = vld [vmem:[%s5736_s11 + $0x44] sm:$0xf]  ;;  %v248_v38 = vld [vmem:[%s5736_s11 + $0x48] sm:$0xf] }
  0x27   : > { %v5783_v51 = vcombine.low %v239_v30, %v240_v39  ;;  %v1978_v55 = vsel %vm411_vm1, %v1974_v45, %v1977_v41  ;;  %4591 = vmatmul.mubr.msk.bf16.vlgmr.msra.gmra.mrb[0].mxu1 %vm608_vm2, %v431_v49  ;;  %v1986_v56 = vshrl.u32 %v5769_v29, 16  ;;  %v440_v57 = vshrl.u32 %v5759_v20, 16 }
  0x28   : > { %v444_v58 = vshll.u32 %v5778_v43, 16  ;;  %4790 = vmatprep.mubr.msk.bf16.mxu0 %vm608_vm2, %v1978_v55  ;;  %4639 = vmatpush3.bf16.msra.mxu1 %v959_v6  ;;  %v1985_v60 = vsel %vm411_vm1, %v1981_v48, %v1984_v46  ;;  %v439_v61 = vsel %vm411_vm1, %v434_v47, %v438_v50  ;;  %v5806_v63 = vcombine.low %v240_v39, %v241_v52  ;;  %v250_v55 = vld [vmem:[%s5736_s11 + $0x50] sm:$0xf] }
  0x29   : > { %7008 = vst [vmem:[#allocation10_spill] sm:$0xff] %v5783_v51  ;;  %v1989_v62 = vshll.u32 %v5783_v51, 16  ;;  %4791 = vmatmul.mubr.msk.bf16.vlgmr.msra.gmra.mrb[0].mxu0 %vm608_vm2, %v1985_v60  ;;  %4594 = vmatprep.mubr.msk.bf16.mxu1 %vm608_vm2, %v439_v61  ;;  %v1988_v4 = vor.u32 %v1986_v56, %v1984_v46  ;;  %v442_v5 = vor.u32 %v440_v57, %v438_v50  ;;  %v1993_v10 = vshrl.u32 %v5783_v51, 16 }
  0x2a   : > { %v446_v7 = vrot.slane %v444_v58, 1  ;;  %v5812_v6 = vcombine.low %v241_v52, %v242_v53  ;;  %4839 = vmatpush3.bf16.msra.mxu0 %v5746_v11  ;;  %v448_v13 = vshrl.u32 %v5778_v43, 16  ;;  %v452_v14 = vshll.u32 %v5806_v63, 16  ;;  %5426 = vmatprep.subr.msk.bf16.mxu1 %vm681_vm0, %v5800_v59  ;;  %v245_v11 = vld [vmem:[%s5736_s11 + $0x3c] sm:$0xf] }
  0x2b   : > { %v1991_v8 = vrot.slane %v1989_v62, 1  ;;  %v5824_v18 = vcombine.low %v242_v53, %v243_v0  ;;  %v5826_v21 = vcombine.low %v243_v0, %v244_v2  ;;  %5431 = vmatprep.subr.msk.bf16.mxu0 %vm681_vm0, %v5790_v54  ;;  %v456_v32 = vshrl.u32 %v5806_v63, 16  ;;  %v249_v53 = vld [vmem:[%s5736_s11 + $0x4c] sm:$0xf] }
  0x2c   : > { %7009 = vst [vmem:[#allocation11_spill] sm:$0xff] %v5812_v6  ;;  %v5821_v15 = vsel %vm411_vm1, %v442_v5, %v446_v7  ;;  %v1996_v17 = vshll.u32 %v5812_v6, 16  ;;  %v450_v26 = vor.u32 %v448_v13, %v446_v7  ;;  %v454_v27 = vrot.slane %v452_v14, 1 }
  0x2d   : > { %7010 = vst [vmem:[#allocation12_spill] sm:$0xff] %v5821_v15  ;;  %7011 = vst [vmem:[#allocation13_spill] sm:$0xff] %v5826_v21  ;;  %v1992_v23 = vsel %vm411_vm1, %v1988_v4, %v1991_v8  ;;  %v1995_v25 = vor.u32 %v1993_v10, %v1991_v8  ;;  %v2000_v30 = vshrl.u32 %v5812_v6, 16  ;;  %v2003_v31 = vshll.u32 %v5826_v21, 16  ;;  %v251_v8 = vld [vmem:[%s5736_s11 + $0x54] sm:$0xf] }
  0x2e   : > { %4794 = vmatprep.mubr.msk.bf16.mxu0 %vm608_vm2, %v1992_v23  ;;  %v1998_v28 = vrot.slane %v1996_v17, 1  ;;  %v5838_v33 = vsel %vm411_vm1, %v450_v26, %v454_v27  ;;  %v460_v34 = vshll.u32 %v5824_v18, 16  ;;  %v5841_v35 = vcombine.low %v244_v2, %v245_v11  ;;  %v252_v10 = vld [vmem:[%s5736_s11 + $0x58] sm:$0xf] }
  0x2f   : > { %7012 = vst [vmem:[#allocation14_spill] sm:$0xff] %v5838_v33  ;;  %v5843_v36 = vcombine.low %v245_v11, %v246_v22  ;;  %4595 = vmatmul.mubr.msk.bf16.gmra.mrb[4].mxu1 %vm608_vm2, %v5821_v15  ;;  %v2005_v41 = vrot.slane %v2003_v31, 1  ;;  %v458_v42 = vor.u32 %v456_v32, %v454_v27  ;;  %v2007_v45 = vshrl.u32 %v5826_v21, 16  ;;  %v253_v32 = vld [vmem:[%s5736_s11 + $0x5c] sm:$0xf] }
  0x30   : > { %v1999_v39 = vsel %vm411_vm1, %v1995_v25, %v1998_v28  ;;  %v2002_v40 = vor.u32 %v2000_v30, %v1998_v28  ;;  %4598 = vmatprep.mubr.msk.bf16.mxu1 %vm608_vm2, %v5838_v33  ;;  %v462_v44 = vrot.slane %v460_v34, 1  ;;  %v464_v47 = vshrl.u32 %v5824_v18, 16  ;;  %v254_v34 = vld [vmem:[%s5736_s11 + $0x60] sm:$0xf]  ;;  %v6130_v33 = vld [vmem:[%s5736_s11 + $0xbc] sm:$0xf] }
  0x31   : > { %7013 = vst [vmem:[#allocation15_spill] sm:$0xff] %v5843_v36  ;;  %v2010_v46 = vshll.u32 %v5843_v36, 16  ;;  %4795 = vmatmul.mubr.msk.bf16.gmra.mrb[4].mxu0 %vm608_vm2, %v1999_v39  ;;  %v468_v49 = vshll.u32 %v5841_v35, 16  ;;  %v5858_v50 = vcombine.low %v246_v22, %v247_v37  ;;  %v5860_v52 = vcombine.low %v247_v37, %v248_v38 }
  0x32   : > { %v2006_v48 = vsel %vm411_vm1, %v2002_v40, %v2005_v41  ;;  %v2009_v56 = vor.u32 %v2007_v45, %v2005_v41  ;;  %v466_v58 = vor.u32 %v464_v47, %v462_v44  ;;  %v5866_v60 = vsel %vm411_vm1, %v458_v42, %v462_v44 }
  0x33   : > { %7014 = vst [vmem:[#allocation16_spill] sm:$0xff] %v5860_v52  ;;  %4798 = vmatprep.mubr.msk.bf16.mxu0 %vm608_vm2, %v2006_v48  ;;  %v2012_v57 = vrot.slane %v2010_v46, 1  ;;  %7015 = vst [vmem:[#allocation17_spill] sm:$0xff] %v5866_v60  ;;  %v470_v61 = vrot.slane %v468_v49, 1  ;;  %v2014_v62 = vshrl.u32 %v5843_v36, 16  ;;  %v2017_v0 = vshll.u32 %v5860_v52, 16 }
  0x34   : > { %v472_v2 = vshrl.u32 %v5841_v35, 16  ;;  %v476_v4 = vshll.u32 %v5858_v50, 16  ;;  %v5872_v5 = vcombine.low %v248_v38, %v249_v53  ;;  %v5874_v7 = vcombine.low %v249_v53, %v250_v55  ;;  %v255_v48 = vld [vmem:[%s5736_s11 + $0x64] sm:$0xf]  ;;  %v256_v49 = vld [vmem:[%s5736_s11 + $0x68] sm:$0xf] }
  0x35   : > { %v2013_v13 = vsel %vm411_vm1, %v2009_v56, %v2012_v57  ;;  %v5880_v14 = vsel %vm411_vm1, %v466_v58, %v470_v61  ;;  %v2016_v17 = vor.u32 %v2014_v62, %v2012_v57  ;;  %v2019_v11 = vrot.slane %v2017_v0, 1 }
  0x36   : > { %7016 = vst [vmem:[#allocation18_spill] sm:$0xff] %v5874_v7  ;;  %7017 = vst [vmem:[#allocation19_spill] sm:$0xff] %v5880_v14  ;;  %v478_v22 = vrot.slane %v476_v4, 1  ;;  %v2021_v23 = vshrl.u32 %v5860_v52, 16  ;;  %v2024_v25 = vshll.u32 %v5874_v7, 16  ;;  %v480_v26 = vshrl.u32 %v5858_v50, 16 }
  0x37   : > { %4599 = vmatmul.mubr.msk.bf16.gmra.mrb[8].mxu1 %vm608_vm2, %v5866_v60  ;;  %v2020_v27 = vsel %vm411_vm1, %v2016_v17, %v2019_v11  ;;  %v484_v28 = vshll.u32 %v5872_v5, 16  ;;  %v5889_v30 = vcombine.low %v250_v55, %v251_v8  ;;  %v5891_v31 = vcombine.low %v251_v8, %v252_v10 }
  0x38   : > { %4602 = vmatprep.mubr.msk.bf16.mxu1 %vm608_vm2, %v5880_v14  ;;  %v474_v37 = vor.u32 %v472_v2, %v470_v61  ;;  %v482_v38 = vor.u32 %v480_v26, %v478_v22  ;;  %v2026_v39 = vrot.slane %v2024_v25, 1  ;;  %v2028_v41 = vshrl.u32 %v5874_v7, 16  ;;  %v258_v25 = vld [vmem:[%s5736_s11 + $0x70] sm:$0xf] }
  0x39   : > { %7018 = vst [vmem:[#allocation20_spill] sm:$0xff] %v5891_v31  ;;  %4799 = vmatmul.mubr.msk.bf16.gmra.mrb[8].mxu0 %vm608_vm2, %v2013_v13  ;;  %v486_v40 = vrot.slane %v484_v28, 1  ;;  %v2031_v42 = vshll.u32 %v5891_v31, 16  ;;  %v2023_v44 = vor.u32 %v2021_v23, %v2019_v11  ;;  %v492_v45 = vshll.u32 %v5889_v30, 16  ;;  %v257_v23 = vld [vmem:[%s5736_s11 + $0x6c] sm:$0xf] }
  0x3a   : > { %4802 = vmatprep.mubr.msk.bf16.mxu0 %vm608_vm2, %v2020_v27  ;;  %v5902_v46 = vcombine.low %v252_v10, %v253_v32  ;;  %v5904_v47 = vcombine.low %v253_v32, %v254_v34  ;;  %v2030_v53 = vor.u32 %v2028_v41, %v2026_v39  ;;  %v5909_v56 = vsel %vm411_vm1, %v474_v37, %v478_v22 }
  0x3b   : > { %v2033_v55 = vrot.slane %v2031_v42, 1  ;;  %7019 = vst [vmem:[#allocation21_spill] sm:$0xff] %v5909_v56  ;;  %v5912_v57 = vsel %vm411_vm1, %v482_v38, %v486_v40  ;;  %v488_v58 = vshrl.u32 %v5872_v5, 16  ;;  %v496_v62 = vshrl.u32 %v5889_v30, 16 }
  0x3c   : > { %7020 = vst [vmem:[#allocation22_spill] sm:$0xff] %v5912_v57  ;;  %v2038_v61 = vshll.u32 %v5904_v47, 16  ;;  %v500_v0 = vshll.u32 %v5902_v46, 16  ;;  %v5918_v2 = vcombine.low %v255_v48, %v256_v49  ;;  %v2027_v4 = vsel %vm411_vm1, %v2023_v44, %v2026_v39 }
  0x3d   : > { %v494_v8 = vrot.slane %v492_v45, 1  ;;  %v2035_v10 = vshrl.u32 %v5891_v31, 16  ;;  %v2034_v13 = vsel %vm411_vm1, %v2030_v53, %v2033_v55  ;;  %v5925_v17 = vcombine.low %v254_v34, %v255_v48  ;;  %v5945_v45 = vld [vmem:[%s5736_s11 + $0x74] sm:$0xf] }
  0x3e   : > { %v2042_v11 = vshrl.u32 %v5904_v47, 16  ;;  %v2045_v22 = vshll.u32 %v5918_v2, 16  ;;  %v490_v26 = vor.u32 %v488_v58, %v486_v40  ;;  %v2040_v27 = vrot.slane %v2038_v61, 1 }
  0x3f   : > { %4603 = vmatmul.mubr.msk.bf16.gmra.mrb[12].mxu1 %vm608_vm2, %v5909_v56  ;;  %v498_v28 = vor.u32 %v496_v62, %v494_v8  ;;  %v502_v32 = vrot.slane %v500_v0, 1  ;;  %v5934_v37 = vcombine.low %v256_v49, %v257_v23  ;;  %v2037_v34 = vor.u32 %v2035_v10, %v2033_v55  ;;  %v5956_v62 = vld [vmem:[%s5736_s11 + $0x78] sm:$0xf]  ;;  %v5959_v0 = vld [vmem:[%s5736_s11 + $0x7c] sm:$0xf] }
  0x40   : > { %4606 = vmatprep.mubr.msk.bf16.mxu1 %vm608_vm2, %v5912_v57  ;;  %v5937_v38 = vcombine.low %v257_v23, %v258_v25  ;;  %v2044_v39 = vor.u32 %v2042_v11, %v2040_v27  ;;  %v2047_v41 = vrot.slane %v2045_v22, 1  ;;  %v508_v42 = vshll.u32 %v5925_v17, 16  ;;  %v6090_v57 = vld [vmem:[%s5736_s11 + $0xac] sm:$0xf] }
  0x41   : > { %4803 = vmatmul.mubr.msk.bf16.gmra.mrb[12].mxu0 %vm608_vm2, %v2027_v4  ;;  %v5941_v40 = vsel %vm411_vm1, %v490_v26, %v494_v8  ;;  %v504_v44 = vshrl.u32 %v5902_v46, 16  ;;  %v5948_v48 = vsel %vm411_vm1, %v498_v28, %v502_v32  ;;  %v512_v49 = vshrl.u32 %v5925_v17, 16 }
  0x42   : > { %4806 = vmatprep.mubr.msk.bf16.mxu0 %vm608_vm2, %v2034_v13  ;;  %7021 = vst [vmem:[#allocation23_spill] sm:$0xff] %v5941_v40  ;;  %7022 = vst [vmem:[#allocation24_spill] sm:$0xff] %v5948_v48  ;;  %v516_v53 = vshll.u32 %v5934_v37, 16  ;;  %v2041_v55 = vsel %vm411_vm1, %v2037_v34, %v2040_v27  ;;  %v2049_v58 = vshrl.u32 %v5918_v2, 16  ;;  %v2052_v61 = vshll.u32 %v5937_v38, 16 }
  0x43   : > { %v2048_v4 = vsel %vm411_vm1, %v2044_v39, %v2047_v41  ;;  %v510_v8 = vrot.slane %v508_v42, 1  ;;  %v5965_v10 = vcombine.low %v258_v25, %v5945_v45  ;;  %v506_v13 = vor.u32 %v504_v44, %v502_v32  ;;  %v5985_v42 = vld [vmem:[%s5736_s11 + $0x80] sm:$0xf]  ;;  %v5988_v44 = vld [vmem:[%s5736_s11 + $0x84] sm:$0xf] }
  0x44   : > { %v518_v22 = vrot.slane %v516_v53, 1  ;;  %v5972_v23 = vcombine.low %v5956_v62, %v5959_v0  ;;  %v2051_v25 = vor.u32 %v2049_v58, %v2047_v41  ;;  %v5975_v26 = vrot.slane %v2052_v61, 1  ;;  %v5998_v58 = vld [vmem:[%s5736_s11 + $0x88] sm:$0xf]  ;;  %v6001_v61 = vld [vmem:[%s5736_s11 + $0x8c] sm:$0xf] }
  0x45   : > { %v514_v11 = vor.u32 %v512_v49, %v510_v8  ;;  %v2491_v27 = vrot.slane %v5753_v16, 1  ;;  %v2492_v28 = vrot.slane %v5764_v24, 1  ;;  %v524_v32 = vshll.u32 %v5965_v10, 16  ;;  %v6038_v16 = vld [vmem:[%s5736_s11 + $0x98] sm:$0xf] }
  0x46   : > { %7023 = vst [vmem:[#allocation25_spill] sm:$0xff] %v5975_v26  ;;  %v5981_v34 = vsel %vm411_vm1, %v506_v13, %v510_v8  ;;  %v520_v39 = vshrl.u32 %v5934_v37, 16  ;;  %v528_v49 = vshrl.u32 %v5965_v10, 16  ;;  %v532_v53 = vshll.u32 %v5972_v23, 16 }
  0x47   : > { %4607 = vmatmul.mubr.msk.bf16.gmra.mrb[16].mxu1 %vm608_vm2, %v5941_v40  ;;  %7024 = vst [vmem:[#allocation26_spill] sm:$0xff] %v5981_v34  ;;  %v5991_v41 = vsel %vm411_vm1, %v514_v11, %v518_v22  ;;  %v526_v8 = vrot.slane %v524_v32, 1  ;;  %v6008_v13 = vcombine.low %v5985_v42, %v5988_v44  ;;  %v6015_v3 = vcombine.low %v5998_v58, %v6001_v61  ;;  %v6087_v40 = vld [vmem:[%s5736_s11 + $0xa8] sm:$0xf] }
  0x48   : > { %4610 = vmatprep.mubr.msk.bf16.mxu1 %vm608_vm2, %v5948_v48  ;;  %7025 = vst [vmem:[#allocation27_spill] sm:$0xff] %v5991_v41  ;;  %v522_v11 = vor.u32 %v520_v39, %v518_v22  ;;  %v2496_v32 = vrot.slane %v5783_v51, 1  ;;  %v536_v39 = vshrl.u32 %v5972_v23, 16  ;;  %v6078_v48 = vld [vmem:[%s5736_s11 + $0xa4] sm:$0xf] }
  0x49   : > { %4807 = vmatmul.mubr.msk.bf16.gmra.mrb[16].mxu0 %vm608_vm2, %v2041_v55  ;;  %v2055_v55 = vsel %vm411_vm1, %v2051_v25, %v5975_v26  ;;  %v530_v25 = vor.u32 %v528_v49, %v526_v8  ;;  %v534_v26 = vrot.slane %v532_v53, 1  ;;  %v540_v24 = vshll.u32 %v6008_v13, 16  ;;  %v6026_v49 = vld [vmem:[%s5736_s11 + $0x90] sm:$0xf]  ;;  %v6029_v53 = vld [vmem:[%s5736_s11 + $0x94] sm:$0xf] }
  0x4a   : > { %4810 = vmatprep.mubr.msk.bf16.mxu0 %vm608_vm2, %v2048_v4  ;;  %v2493_v4 = vsel %vm1188_vm3, %v2491_v27, %v2492_v28  ;;  %v2494_v27 = vrot.slane %v5769_v29, 1  ;;  %v6022_v22 = vsel %vm411_vm1, %v522_v11, %v526_v8  ;;  %v548_v29 = vshll.u32 %v6015_v3, 16 }
  0x4b   : > { %7026 = vst [vmem:[#allocation28_spill] sm:$0xff] %v6022_v22  ;;  %v2907_v8 = vsel %vm681_vm0, %v5790_v54, 0 }
  0x4c   : > { %v2495_v51 = vsel %vm1188_vm3, %v2492_v28, %v2494_v27  ;;  %v2497_v11 = vsel %vm1188_vm3, %v2494_v27, %v2496_v32  ;;  %v538_v28 = vor.u32 %v536_v39, %v534_v26  ;;  %v550_v27 = vrot.slane %v548_v29, 1 }
  0x4d   : > { %v2500_v39 = vrot.slane %v5826_v21, 1 }
  0x4f   : > { %4611 = vmatmul.mubr.msk.bf16.gmra.mrb[20].mxu1 %vm608_vm2, %v5981_v34  ;;  %v6050_v34 = vcombine.low %v6026_v49, %v6029_v53 }
  0x50   : > { %4614 = vmatprep.mubr.msk.bf16.mxu1 %vm608_vm2, %v5991_v41  ;;  %v6041_v41 = vld [vmem:[%s5736_s11 + $0x9c] sm:$0xf] }
  0x51   : > { %4811 = vmatmul.mubr.msk.bf16.gmra.mrb[20].mxu0 %vm608_vm2, %v2055_v55  ;;  %v6032_v55 = vsel %vm411_vm1, %v530_v25, %v534_v26  ;;  %v542_v25 = vrot.slane %v540_v24, 1  ;;  %v6062_v24 = vcombine.low %v6038_v16, %v6041_v41  ;;  %v2498_v26 = vrot.slane %v5812_v6, 1 }
  0x52   : > { %4840 = vmatprep.mubr.msk.bf16.mxu0 %vm608_vm2, %v2493_v4  ;;  %7027 = vst [vmem:[#allocation29_spill] sm:$0xff] %v6032_v55  ;;  %v544_v4 = vshrl.u32 %v6008_v13, 16 }
  0x53   : > { %7028 = vst [vmem:[#allocation30_spill] sm:$0xff] %v6062_v24  ;;  %v6071_v29 = vsel %vm411_vm1, %v538_v28, %v542_v25  ;;  %v564_v21 = vshll.u32 %v6062_v24, 16  ;;  %v2499_v6 = vsel %vm1188_vm3, %v2496_v32, %v2498_v26 }
  0x54   : > { %v546_v54 = vor.u32 %v544_v4, %v542_v25  ;;  %7029 = vst [vmem:[#allocation31_spill] sm:$0xff] %v6071_v29  ;;  %v6075_v4 = vld [vmem:[%s5736_s11 + $0xa0] sm:$0xf]  ;;  %v2501_v25 = vsel %vm1188_vm3, %v2498_v26, %v2500_v39  ;;  %v2504_v26 = vrot.slane %v5860_v52, 1 }
  0x55   : > { %v566_v14 = vrot.slane %v564_v21, 1  ;;  %v6118_v21 = vld [vmem:[%s5736_s11 + $0xb4] sm:$0xf] }
  0x57   : > { %4615 = vmatmul.mubr.msk.bf16.gmra.mrb[24].mxu1 %vm608_vm2, %v6022_v22  ;;  %v6057_v22 = vld [vmem:[%s6964_s1 + $0xe] sm:$0x3] }
  0x58   : > { %4618 = vmatprep.mubr.msk.bf16.mxu1 %vm608_vm2, %v6032_v55  ;;  %v556_v55 = vshll.u32 %v6050_v34, 16 }
  0x59   : > { %4841 = vmatmul.mubr.msk.bf16.vlgmr.msra.gmra.mrb[0].mxu0 %vm608_vm2, %v2495_v51  ;;  %v552_v51 = vshrl.u32 %v6015_v3, 16 }
  0x5a   : > { %4889 = vmatpush3.bf16.msra.mxu0 %v2907_v8  ;;  %4844 = vmatprep.mubr.msk.bf16.mxu0 %vm608_vm2, %v2497_v11  ;;  %v6081_v8 = vsel %vm411_vm1, %v546_v54, %v550_v27  ;;  %v560_v11 = vshrl.u32 %v6050_v34, 16  ;;  %v558_v28 = vrot.slane %v556_v55, 1  ;;  %v6097_v54 = vcombine.low %v6075_v4, %v6078_v48 }
  0x5b   : > { %5432 = vmatprep.subr.msk.bf16.mxu0 %vm681_vm0, %v6057_v22  ;;  %7030 = vst [vmem:[#allocation32_spill] sm:$0xff] %v6081_v8  ;;  %v554_v32 = vor.u32 %v552_v51, %v550_v27  ;;  %v2502_v55 = vrot.slane %v5843_v36, 1  ;;  %v6115_v51 = vld [vmem:[%s5736_s11 + $0xb0] sm:$0xf] }
  0x5c   : > { %7031 = vst [vmem:[#allocation33_spill] sm:$0xff] %v6097_v54  ;;  %v562_v56 = vor.u32 %v560_v11, %v558_v28  ;;  %v572_v60 = vshll.u32 %v6097_v54, 16 }
  0x5d   : > { %v6111_v27 = vsel %vm411_vm1, %v554_v32, %v558_v28  ;;  %v2503_v52 = vsel %vm1188_vm3, %v2500_v39, %v2502_v55  ;;  %v2505_v28 = vsel %vm1188_vm3, %v2502_v55, %v2504_v26  ;;  %v2508_v55 = vrot.slane %v5891_v31, 1 }
  0x5e   : > { %7032 = vst [vmem:[#allocation34_spill] sm:$0xff] %v6111_v27  ;;  %v6121_v11 = vsel %vm411_vm1, %v562_v56, %v566_v14  ;;  %v574_v32 = vrot.slane %v572_v60, 1  ;;  %v6137_v56 = vcombine.low %v6115_v51, %v6118_v21  ;;  %v2506_v60 = vrot.slane %v5874_v7, 1 }
  0x5f   : > { %4619 = vmatmul.mubr.msk.bf16.gmra.mrb[28].mxu1 %vm608_vm2, %v6071_v29  ;;  %v6104_v29 = vcombine.low %v6087_v40, %v6090_v57  ;;  %7033 = vst [vmem:[#allocation35_spill] sm:$0xff] %v6121_v11 }
  0x60   : > { %4622 = vmatprep.mubr.msk.bf16.mxu1 %vm608_vm2, %v6081_v8  ;;  %v6127_v8 = vld [vmem:[%s5736_s11 + $0xb8] sm:$0xf]  ;;  %v2509_v31 = vsel %vm1188_vm3, %v2506_v60, %v2508_v55 }
  0x61   : > { %4845 = vmatmul.mubr.msk.bf16.gmra.mrb[4].mxu0 %vm608_vm2, %v2499_v6  ;;  %v568_v6 = vshrl.u32 %v6062_v24, 16  ;;  %v580_v36 = vshll.u32 %v6104_v29, 16 }
  0x62   : > { %4848 = vmatprep.mubr.msk.bf16.mxu0 %vm608_vm2, %v2501_v25  ;;  %v576_v25 = vshrl.u32 %v6097_v54, 16  ;;  %v6144_v54 = vcombine.low %v6127_v8, %v6130_v33 }
  0x63   : > { %v570_v15 = vor.u32 %v568_v6, %v566_v14  ;;  %v582_v1 = vrot.slane %v580_v36, 1  ;;  %v584_v14 = vshrl.u32 %v6104_v29, 16  ;;  %v592_v36 = vshrl.u32 %v6137_v56, 16 }
  0x64   : > { %v578_v39 = vor.u32 %v576_v25, %v574_v32  ;;  %v596_v6 = vshll.u32 %v6144_v54, 16  ;;  %v6160_v25 = vld [vmem:[%s5736_s11 + $0xc0] sm:$0xf] }
  0x65   : > { %v6151_v24 = vsel %vm411_vm1, %v570_v15, %v574_v32  ;;  %v586_v32 = vor.u32 %v584_v14, %v582_v1 }
  0x66   : > { %7034 = vst [vmem:[#allocation36_spill] sm:$0xff] %v6151_v24 }
  0x67   : > { %4623 = vmatmul.mubr.msk.bf16.gmra.mrb[32].mxu1 %vm608_vm2, %v6111_v27  ;;  %v588_v27 = vshll.u32 %v6137_v56, 16 }
  0x68   : > { %4626 = vmatprep.mubr.msk.bf16.mxu1 %vm608_vm2, %v6121_v11  ;;  %v598_v11 = vrot.slane %v596_v6, 1 }
  0x69   : > { %4849 = vmatmul.mubr.msk.bf16.gmra.mrb[8].mxu0 %vm608_vm2, %v2503_v52  ;;  %v6155_v52 = vsel %vm411_vm1, %v578_v39, %v582_v1  ;;  %v590_v15 = vrot.slane %v588_v27, 1  ;;  %v6170_v39 = vcombine.low %v6160_v25, %v6160_v25 }
  0x6a   : > { %4852 = vmatprep.mubr.msk.bf16.mxu0 %vm608_vm2, %v2505_v28  ;;  %v2507_v28 = vsel %vm1188_vm3, %v2504_v26, %v2506_v60  ;;  %v2510_v26 = vrot.slane %v5904_v47, 1  ;;  %v600_v60 = vshrl.u32 %v6144_v54, 16 }
  0x6b   : > { %v594_v7 = vor.u32 %v592_v36, %v590_v15  ;;  %v6177_v27 = vsel %vm411_vm1, %v586_v32, %v590_v15  ;;  %v604_v1 = vshll.u32 %v6170_v39, 16  ;;  %v6190_v36 = vcombine.low %v5945_v45, %v5956_v62 }
  0x6c   : > { %v6194_v6 = vor.u32 %v600_v60, %v598_v11  ;;  %v6205_v62 = vcombine.low %v5959_v0, %v5985_v42 }
  0x6d   : > { %v6182_v14 = vsel %vm411_vm1, %v594_v7, %v598_v11  ;;  %v606_v15 = vrot.slane %v604_v1, 1  ;;  %v2514_v7 = vrot.slane %v5937_v38, 1  ;;  %v6230_v1 = vld [vmem:[%s6964_s1 + $0x6] sm:$0x3] }
  0x6e   : > { %v2518_v0 = vrot.slane %v6205_v62, 1 }
  0x6f   : > { %4627 = vmatmul.mubr.msk.bf16.gmra.mrb[36].mxu1 %vm608_vm2, %v6151_v24  ;;  %v2512_v24 = vrot.slane %v5918_v2, 1  ;;  %v607_v32 = vsel %vm411_vm1, %v6194_v6, %v606_v15 }
  0x70   : > { %4630 = vmatprep.mubr.msk.bf16.mxu1 %vm608_vm2, %v6155_v52 }
  0x71   : > { %4853 = vmatmul.mubr.msk.bf16.gmra.mrb[12].mxu0 %vm608_vm2, %v2507_v28  ;;  %v2511_v28 = vsel %vm1188_vm3, %v2508_v55, %v2510_v26  ;;  %v2516_v55 = vrot.slane %v6190_v36, 1  ;;  %v2515_v45 = vsel %vm1188_vm3, %v2512_v24, %v2514_v7 }
  0x72   : > { %4856 = vmatprep.mubr.msk.bf16.mxu0 %vm608_vm2, %v2509_v31  ;;  %v2513_v31 = vsel %vm1188_vm3, %v2510_v26, %v2512_v24  ;;  %v6211_v26 = vcombine.low %v5988_v44, %v5998_v58  ;;  %v1311_v24 = vsel %vm681_vm0, %v5800_v59, 0  ;;  %v6224_v44 = vcombine.low %v6001_v61, %v6026_v49  ;;  %v279_v58 = vld [vmem:[%s5736_s11 + $0xc4] sm:$0xf]  ;;  %v280_v61 = vld [vmem:[%s5736_s11 + $0xc8] sm:$0xf] }
  0x73   : > { %v2517_v11 = vsel %vm1188_vm3, %v2514_v7, %v2516_v55  ;;  %v2519_v60 = vsel %vm1188_vm3, %v2516_v55, %v2518_v0  ;;  %v6237_v59 = vcombine.low %v6029_v53, %v6038_v16  ;;  %v281_v49 = vld [vmem:[%s5736_s11 + $0xcc] sm:$0xf]  ;;  %v6257_v55 = vcombine.low %v6041_v41, %v6075_v4 }
  0x74   : > { %v2520_v42 = vrot.slane %v6211_v26, 1  ;;  %v6249_v15 = vcombine.low %v280_v61, %v281_v49  ;;  %v2522_v16 = vrot.slane %v6224_v44, 1 }
  0x75   : > { %v2524_v53 = vrot.slane %v6237_v59, 1 }
  0x76   : > { %v2523_v7 = vsel %vm1188_vm3, %v2520_v42, %v2522_v16 }
  0x77   : > { %4631 = vmatmul.mubr.msk.bf16.gmra.mrb[40].mxu1 %vm608_vm2, %v6177_v27 }
  0x78   : > { %4634 = vmatprep.mubr.msk.bf16.mxu1 %vm608_vm2, %v6182_v14 }
  0x79   : > { %4857 = vmatmul.mubr.msk.bf16.gmra.mrb[16].mxu0 %vm608_vm2, %v2511_v28  ;;  %v2521_v28 = vsel %vm1188_vm3, %v2518_v0, %v2520_v42  ;;  %v6275_v0 = vcombine.low %v6090_v57, %v6115_v51  ;;  %v6292_v51 = vcombine.low %v6130_v33, %v6160_v25 }
  0x7a   : > { %4860 = vmatprep.mubr.msk.bf16.mxu0 %vm608_vm2, %v2513_v31  ;;  %v6240_v31 = vcombine.low %v6160_v25, %v279_v58 }
  0x7b   : > { %v2530_v42 = vrot.slane %v6275_v0, 1 }
  0x7f   : > { %4635 = vmatmul.mubr.msk.bf16.gmra.mrb[44].mxu1 %vm608_vm2, %v607_v32  ;;  %v2525_v32 = vsel %vm1188_vm3, %v2522_v16, %v2524_v53 }
  0x80   : > { %4640 = vmatprep.mubr.msk.bf16.mxu1 %vm608_vm2, %v5742_v9 }
  0x81   : > { %4861 = vmatmul.mubr.msk.bf16.gmra.mrb[20].mxu0 %vm608_vm2, %v2515_v45  ;;  %v6264_v45 = vcombine.low %v6078_v48, %v6087_v40  ;;  %v6282_v48 = vcombine.low %v6118_v21, %v6127_v8  ;;  %v6298_v21 = vcombine.low %v279_v58, %v280_v61 }
  0x82   : > { %4864 = vmatprep.mubr.msk.bf16.mxu0 %vm608_vm2, %v2517_v11  ;;  %v2526_v11 = vrot.slane %v6257_v55, 1 }
  0x83   : > { %v2528_v41 = vrot.slane %v6264_v45, 1  ;;  %v2532_v57 = vrot.slane %v6282_v48, 1  ;;  %v2536_v33 = vrot.slane %v6298_v21, 1 }
  0x84   : > { %v2527_v4 = vsel %vm1188_vm3, %v2524_v53, %v2526_v11  ;;  %v6334_v53 = vld [vmem:[%s6964_s1 + $0x10] sm:$0x3] }
  0x85   : > { %v2529_v40 = vsel %vm1188_vm3, %v2526_v11, %v2528_v41  ;;  %v2533_v8 = vsel %vm1188_vm3, %v2530_v42, %v2532_v57  ;;  %v1190_v11 = vrot.slane %v5748_v12, 1 }
  0x87   : > { %4641 = vmatmul.mubr.msk.bf16.vlgmr.msra.gmra.mrb[0].mxu1 %vm608_vm2, %v5748_v12  ;;  %v1689_v12 = vsel %vm681_vm0, %v6230_v1, 0 }
  0x88   : > { %4689 = vmatpush3.bf16.msra.mxu1 %v1311_v24  ;;  %4644 = vmatprep.mubr.msk.bf16.mxu1 %vm608_vm2, %v5757_v19  ;;  %v2531_v24 = vsel %vm1188_vm3, %v2528_v41, %v2530_v42 }
  0x89   : > { %4865 = vmatmul.mubr.msk.bf16.gmra.mrb[24].mxu0 %vm608_vm2, %v2519_v60  ;;  %5427 = vmatprep.subr.msk.bf16.mxu1 %vm681_vm0, %v6230_v1  ;;  %v2534_v60 = vrot.slane %v6292_v51, 1 }
  0x8a   : > { %4868 = vmatprep.mubr.msk.bf16.mxu0 %vm608_vm2, %v2521_v28  ;;  %v6307_v28 = vcombine.low %v281_v49, %v281_v49  ;;  %v3226_v49 = vsel %vm681_vm0, %v6057_v22, 0  ;;  %v7035_v22 = vld [vmem:[#allocation30_spill] sm:$0xff] }
  0x8b   : > { %v2535_v25 = vsel %vm1188_vm3, %v2532_v57, %v2534_v60  ;;  %v2537_v58 = vsel %vm1188_vm3, %v2534_v60, %v2536_v33  ;;  %v7037_v57 = vld [vmem:[#allocation5_spill] sm:$0xff] }
  0x8c   : > { %v2538_v61 = vrot.slane %v6307_v28, 1 }
  0x8e   : > { %v2539_v16 = vsel %vm1188_vm3, %v2536_v33, %v2538_v61 }
  0x8f   : > { %4645 = vmatmul.mubr.msk.bf16.gmra.mrb[4].mxu1 %vm608_vm2, %v5759_v20 }
  0x90   : > { %4648 = vmatprep.mubr.msk.bf16.mxu1 %vm608_vm2, %v5778_v43 }
  0x91   : > { %4869 = vmatmul.mubr.msk.bf16.gmra.mrb[28].mxu0 %vm608_vm2, %v2523_v7  ;;  %v7036_v7 = vld [vmem:[#allocation33_spill] sm:$0xff] }
  0x92   : > { %4872 = vmatprep.mubr.msk.bf16.mxu0 %vm608_vm2, %v2525_v32  ;;  %v1189_v32 = vrot.slane %v5742_v9, 1 }
  0x94   : > { %v1191_v41 = vsel %vm1188_vm3, %v1189_v32, %v1190_v11 }
  0x97   : > { %4649 = vmatmul.mubr.msk.bf16.gmra.mrb[8].mxu1 %vm608_vm2, %v5806_v63 }
  0x98   : > { %4652 = vmatprep.mubr.msk.bf16.mxu1 %vm608_vm2, %v5824_v18 }
  0x99   : > { %4873 = vmatmul.mubr.msk.bf16.gmra.mrb[32].mxu0 %vm608_vm2, %v2527_v4  ;;  %v1192_v4 = vrot.slane %v5757_v19, 1  ;;  %v1196_v19 = vrot.slane %v5778_v43, 1 }
  0x9a   : > { %4876 = vmatprep.mubr.msk.bf16.mxu0 %vm608_vm2, %v2529_v40  ;;  %v1194_v40 = vrot.slane %v5759_v20, 1 }
  0x9b   : > { %v1193_v9 = vsel %vm1188_vm3, %v1190_v11, %v1192_v4  ;;  %v7038_v11 = vld [vmem:[#allocation12_spill] sm:$0xff] }
  0x9c   : > { %v1195_v42 = vsel %vm1188_vm3, %v1192_v4, %v1194_v40  ;;  %v6401_v1 = vsel %vm1188_vm3, %v1194_v40, %v1196_v19  ;;  %v7039_v40 = vld [vmem:[#allocation14_spill] sm:$0xff] }
  0x9f   : > { %4653 = vmatmul.mubr.msk.bf16.gmra.mrb[12].mxu1 %vm608_vm2, %v5841_v35 }
  0xa0   : > { %4656 = vmatprep.mubr.msk.bf16.mxu1 %vm608_vm2, %v5858_v50 }
  0xa1   : > { %4877 = vmatmul.mubr.msk.bf16.gmra.mrb[36].mxu0 %vm608_vm2, %v2531_v24 }
  0xa2   : > { %4880 = vmatprep.mubr.msk.bf16.mxu0 %vm608_vm2, %v2533_v8 }
  0xa7   : > { %4657 = vmatmul.mubr.msk.bf16.gmra.mrb[16].mxu1 %vm608_vm2, %v5872_v5 }
  0xa8   : > { %4660 = vmatprep.mubr.msk.bf16.mxu1 %vm608_vm2, %v5889_v30 }
  0xa9   : > { %4881 = vmatmul.mubr.msk.bf16.gmra.mrb[40].mxu0 %vm608_vm2, %v2535_v25 }
  0xaa   : > { %4884 = vmatprep.mubr.msk.bf16.mxu0 %vm608_vm2, %v2537_v58 }
  0xaf   : > { %4661 = vmatmul.mubr.msk.bf16.gmra.mrb[20].mxu1 %vm608_vm2, %v5902_v46 }
  0xb0   : > { %4664 = vmatprep.mubr.msk.bf16.mxu1 %vm608_vm2, %v5925_v17 }
  0xb1   : > { %4885 = vmatmul.mubr.msk.bf16.gmra.mrb[44].mxu0 %vm608_vm2, %v2539_v16 }
  0xb2   : > { %4890 = vmatprep.mubr.msk.bf16.mxu0 %vm608_vm2, %v5759_v20  ;;  %v1198_v20 = vrot.slane %v5806_v63, 1 }
  0xb4   : > { %v6404_v24 = vsel %vm1188_vm3, %v1196_v19, %v1198_v20 }
  0xb7   : > { %4665 = vmatmul.mubr.msk.bf16.gmra.mrb[24].mxu1 %vm608_vm2, %v5934_v37 }
  0xb8   : > { %4668 = vmatprep.mubr.msk.bf16.mxu1 %vm608_vm2, %v5965_v10 }
  0xb9   : > { %4891 = vmatmul.mubr.msk.bf16.vlgmr.msra.gmra.mrb[0].mxu0 %vm608_vm2, %v5778_v43  ;;  %v1200_v43 = vrot.slane %v5824_v18, 1 }
  0xba   : > { %4939 = vmatpush3.bf16.msra.mxu0 %v3226_v49  ;;  %4894 = vmatprep.mubr.msk.bf16.mxu0 %vm608_vm2, %v5806_v63  ;;  %v1202_v63 = vrot.slane %v5841_v35, 1  ;;  %v6468_v49 = vld [vmem:[%s5736_s11 + $0xd0] sm:$0xff]  }
  0xbb   : > { %5433 = vmatprep.subr.msk.bf16.mxu0 %vm681_vm0, %v6334_v53  ;;  %v6417_v8 = vsel %vm1188_vm3, %v1198_v20, %v1200_v43  ;;  %v7042_v20 = vld [vmem:[#allocation21_spill] sm:$0xff] }
  0xbc   : > { %v6420_v60 = vsel %vm1188_vm3, %v1200_v43, %v1202_v63 }
  0xbf   : > { %4669 = vmatmul.mubr.msk.bf16.gmra.mrb[28].mxu1 %vm608_vm2, %v5972_v23 }
  0xc0   : > { %4672 = vmatprep.mubr.msk.bf16.mxu1 %vm608_vm2, %v6008_v13 }
  0xc1   : > { %4895 = vmatmul.mubr.msk.bf16.gmra.mrb[4].mxu0 %vm608_vm2, %v5824_v18  ;;  %v1204_v18 = vrot.slane %v5858_v50, 1 }
  0xc2   : > { %4898 = vmatprep.mubr.msk.bf16.mxu0 %vm608_vm2, %v5841_v35  ;;  %v1206_v35 = vrot.slane %v5872_v5, 1 }
  0xc3   : > { %v6433_v33 = vsel %vm1188_vm3, %v1202_v63, %v1204_v18  ;;  %v7043_v63 = vld [vmem:[#allocation22_spill] sm:$0xff] }
  0xc4   : > { %v6436_v25 = vsel %vm1188_vm3, %v1204_v18, %v1206_v35  ;;  %v7044_v18 = vld [vmem:[#allocation23_spill] sm:$0xff] }
  0xc7   : > { %4673 = vmatmul.mubr.msk.bf16.gmra.mrb[32].mxu1 %vm608_vm2, %v6015_v3 }
  0xc8   : > { %4676 = vmatprep.mubr.msk.bf16.mxu1 %vm608_vm2, %v6050_v34 }
  0xc9   : > { %4899 = vmatmul.mubr.msk.bf16.gmra.mrb[8].mxu0 %vm608_vm2, %v5858_v50  ;;  %v1208_v50 = vrot.slane %v5889_v30, 1 }
  0xca   : > { %4902 = vmatprep.mubr.msk.bf16.mxu0 %vm608_vm2, %v5872_v5  ;;  %v1210_v5 = vrot.slane %v5902_v46, 1 }
  0xcb   : > { %v6449_v58 = vsel %vm1188_vm3, %v1206_v35, %v1208_v50 }
  0xcc   : > { %v6452_v61 = vsel %vm1188_vm3, %v1208_v50, %v1210_v5 }
  0xcf   : > { %4677 = vmatmul.mubr.msk.bf16.gmra.mrb[36].mxu1 %vm608_vm2, %v7035_v22 }
  0xd0   : > { %4680 = vmatprep.mubr.msk.bf16.mxu1 %vm608_vm2, %v7036_v7 }
  0xd1   : > { %4903 = vmatmul.mubr.msk.bf16.gmra.mrb[12].mxu0 %vm608_vm2, %v5889_v30  ;;  %v1212_v30 = vrot.slane %v5925_v17, 1 }
  0xd2   : > { %4906 = vmatprep.mubr.msk.bf16.mxu0 %vm608_vm2, %v5902_v46  ;;  %v1214_v46 = vrot.slane %v5934_v37, 1 }
  0xd3   : > { %v6465_v16 = vsel %vm1188_vm3, %v1210_v5, %v1212_v30  ;;  %v7045_v5 = vld [vmem:[#allocation24_spill] sm:$0xff] }
  0xd4   : > { %v6471_v32 = vsel %vm1188_vm3, %v1212_v30, %v1214_v46  ;;  %v7046_v30 = vld [vmem:[#allocation26_spill] sm:$0xff] }
  0xd7   : > { %4681 = vmatmul.mubr.msk.bf16.gmra.mrb[40].mxu1 %vm608_vm2, %v6104_v29 }
  0xd8   : > { %4684 = vmatprep.mubr.msk.bf16.mxu1 %vm608_vm2, %v6137_v56 }
  0xd9   : > { %4907 = vmatmul.mubr.msk.bf16.gmra.mrb[16].mxu0 %vm608_vm2, %v5925_v17  ;;  %v1216_v17 = vrot.slane %v5965_v10, 1 }
  0xda   : > { %4910 = vmatprep.mubr.msk.bf16.mxu0 %vm608_vm2, %v5934_v37  ;;  %v1218_v37 = vrot.slane %v5972_v23, 1 }
  0xdc   : > { %v6487_v4 = vsel %vm1188_vm3, %v1216_v17, %v1218_v37 }
  0xdf   : > { %4685 = vmatmul.mubr.msk.bf16.gmra.mrb[44].mxu1 %vm608_vm2, %v6144_v54 }
  0xe0   : > { %4690 = vmatprep.mubr.msk.bf16.mxu1 %vm608_vm2, %v1191_v41  ;;  %v6484_v41 = vsel %vm1188_vm3, %v1214_v46, %v1216_v17 }
  0xe1   : > { %4911 = vmatmul.mubr.msk.bf16.gmra.mrb[20].mxu0 %vm608_vm2, %v5965_v10  ;;  %v3524_v10 = vsel %vm681_vm0, %v6334_v53, 0  ;;  %v7041_v53 = vld [vmem:[#allocation19_spill] sm:$0xff] }
  0xe2   : > { %4914 = vmatprep.mubr.msk.bf16.mxu0 %vm608_vm2, %v5972_v23  ;;  %v1220_v23 = vrot.slane %v6008_v13, 1 }
  0xe7   : > { %4691 = vmatmul.mubr.msk.bf16.vlgmr.msra.gmra.mrb[0].mxu1 %vm608_vm2, %v1193_v9  ;;  %v1222_v9 = vrot.slane %v6015_v3, 1 }
  0xe8   : > { %4739 = vmatpush3.bf16.msra.mxu1 %v1689_v12  ;;  %4694 = vmatprep.mubr.msk.bf16.mxu1 %vm608_vm2, %v1195_v42  ;;  %v7040_v12 = vld [vmem:[#allocation17_spill] sm:$0xff]  ;;  %v6502_v42 = vsel %vm1188_vm3, %v1218_v37, %v1220_v23  ;;  %v7048_v37 = vld [vmem:[#allocation28_spill] sm:$0xff] }
  0xe9   : > { %4915 = vmatmul.mubr.msk.bf16.gmra.mrb[24].mxu0 %vm608_vm2, %v6008_v13  ;;  %5429 = vmatprep.subr.msk.bf16.mxu1 %vm681_vm0, %v7037_v57  ;;  %v6505_v19 = vsel %vm1188_vm3, %v1220_v23, %v1222_v9  ;;  %v1224_v13 = vrot.slane %v6050_v34, 1  ;;  %v7050_v23 = vld [vmem:[#allocation29_spill] sm:$0xff] }
  0xea   : > { %4918 = vmatprep.mubr.msk.bf16.mxu0 %vm608_vm2, %v6015_v3  ;;  %v1226_v3 = vrot.slane %v7035_v22, 1 }
  0xeb   : > { %v6518_v57 = vsel %vm1188_vm3, %v1222_v9, %v1224_v13  ;;  %v7053_v9 = vld [vmem:[#allocation6_spill] sm:$0xff] }
  0xec   : > { %v6521_v43 = vsel %vm1188_vm3, %v1224_v13, %v1226_v3  ;;  %v7055_v13 = vld [vmem:[#allocation32_spill] sm:$0xff] }
  0xef   : > { %4695 = vmatmul.mubr.msk.bf16.gmra.mrb[4].mxu1 %vm608_vm2, %v6401_v1 }
  0xf0   : > { %4698 = vmatprep.mubr.msk.bf16.mxu1 %vm608_vm2, %v6404_v24 }
  0xf1   : > { %4919 = vmatmul.mubr.msk.bf16.gmra.mrb[28].mxu0 %vm608_vm2, %v6050_v34  ;;  %v1228_v34 = vrot.slane %v7036_v7, 1 }
  0xf2   : > { %4922 = vmatprep.mubr.msk.bf16.mxu0 %vm608_vm2, %v7035_v22  ;;  %v1230_v22 = vrot.slane %v6104_v29, 1 }
  0xf3   : > { %v6534_v35 = vsel %vm1188_vm3, %v1226_v3, %v1228_v34  ;;  %v7057_v3 = vld [vmem:[#allocation10_spill] sm:$0xff] }
  0xf4   : > { %v6537_v50 = vsel %vm1188_vm3, %v1228_v34, %v1230_v22  ;;  %v7059_v34 = vld [vmem:[#allocation35_spill] sm:$0xff] }
  0xf7   : > { %4699 = vmatmul.mubr.msk.bf16.gmra.mrb[8].mxu1 %vm608_vm2, %v6417_v8 }
  0xf8   : > { %4702 = vmatprep.mubr.msk.bf16.mxu1 %vm608_vm2, %v6420_v60 }
  0xf9   : > { %4923 = vmatmul.mubr.msk.bf16.gmra.mrb[32].mxu0 %vm608_vm2, %v7036_v7  ;;  %v1232_v7 = vrot.slane %v6137_v56, 1 }
  0xfa   : > { %4926 = vmatprep.mubr.msk.bf16.mxu0 %vm608_vm2, %v6104_v29  ;;  %v6547_v29 = vrot.slane %v6144_v54, 1 }
  0xfb   : > { %v6552_v46 = vsel %vm1188_vm3, %v1230_v22, %v1232_v7  ;;  %v7061_v22 = vld [vmem:[#allocation13_spill] sm:$0xff] }
  0xfc   : > { %v6556_v17 = vsel %vm1188_vm3, %v1232_v7, %v6547_v29  ;;  %v7062_v7 = vld [vmem:[#allocation15_spill] sm:$0xff] }
  0xff   : > { %4703 = vmatmul.mubr.msk.bf16.gmra.mrb[12].mxu1 %vm608_vm2, %v6433_v33 }
 0x100   : > { %4706 = vmatprep.mubr.msk.bf16.mxu1 %vm608_vm2, %v6436_v25 }
 0x101   : > { %4927 = vmatmul.mubr.msk.bf16.gmra.mrb[36].mxu0 %vm608_vm2, %v6137_v56  ;;  %v1236_v56 = vrot.slane %v6170_v39, 1  ;;  %v7052_v39 = vld [vmem:[#allocation8_spill] sm:$0xff] }
 0x102   : > { %4930 = vmatprep.mubr.msk.bf16.mxu0 %vm608_vm2, %v6144_v54  ;;  %v7047_v54 = vld [vmem:[#allocation27_spill] sm:$0xff] }
 0x107   : > { %4707 = vmatmul.mubr.msk.bf16.gmra.mrb[16].mxu1 %vm608_vm2, %v6449_v58 }
 0x108   : > { %4710 = vmatprep.mubr.msk.bf16.mxu1 %vm608_vm2, %v6452_v61 }
 0x109   : > { %4931 = vmatmul.mubr.msk.bf16.gmra.mrb[40].mxu0 %vm608_vm2, %v6240_v31 }
 0x10a   : > { %4934 = vmatprep.mubr.msk.bf16.mxu0 %vm608_vm2, %v6249_v15 }
 0x10f   : > { %4711 = vmatmul.mubr.msk.bf16.gmra.mrb[20].mxu1 %vm608_vm2, %v6465_v16 }
 0x110   : > { %4714 = vmatprep.mubr.msk.bf16.mxu1 %vm608_vm2, %v6471_v32 }
 0x111   : > { %4935 = vmatmul.mubr.msk.bf16.gmra.mrb[44].mxu0 %vm608_vm2, %v6468_v49 }
 0x112   : > { %4940 = vmatprep.mubr.msk.bf16.mxu0 %vm608_vm2, %v7038_v11  ;;  %v1237_v11 = vsel %vm1188_vm3, %v6547_v29, %v1236_v56  ;;  %v3191_v56 = vshrl.u32 %v6240_v31, 16 }
 0x117   : > { %4715 = vmatmul.mubr.msk.bf16.gmra.mrb[24].mxu1 %vm608_vm2, %v6484_v41 }
 0x118   : > { %4718 = vmatprep.mubr.msk.bf16.mxu1 %vm608_vm2, %v6487_v4 }
 0x119   : > { %4941 = vmatmul.mubr.msk.bf16.vlgmr.msra.gmra.mrb[0].mxu0 %vm608_vm2, %v7039_v40  ;;  %v7051_v40 = vld [vmem:[#allocation31_spill] sm:$0xff] }
 0x11a   : > { %4989 = vmatpush3.bf16.msra.mxu0 %v3524_v10  ;;  %4944 = vmatprep.mubr.msk.bf16.mxu0 %vm608_vm2, %v7040_v12  ;;  %v7049_v10 = vld [vmem:[#allocation7_spill] sm:$0xff]  ;;  %v7054_v12 = vld [vmem:[#allocation9_spill] sm:$0xff] }
 0x11f   : > { %4719 = vmatmul.mubr.msk.bf16.gmra.mrb[28].mxu1 %vm608_vm2, %v6502_v42 }
 0x120   : > { %4722 = vmatprep.mubr.msk.bf16.mxu1 %vm608_vm2, %v6505_v19 }
 0x121   : > { %4945 = vmatmul.mubr.msk.bf16.gmra.mrb[4].mxu0 %vm608_vm2, %v7041_v53  ;;  %v7056_v53 = vld [vmem:[#allocation34_spill] sm:$0xff] }
 0x122   : > { %4948 = vmatprep.mubr.msk.bf16.mxu0 %vm608_vm2, %v7042_v20  ;;  %v7058_v20 = vld [vmem:[#allocation11_spill] sm:$0xff] }
 0x127   : > { %4723 = vmatmul.mubr.msk.bf16.gmra.mrb[32].mxu1 %vm608_vm2, %v6518_v57 }
 0x128   : > { %4726 = vmatprep.mubr.msk.bf16.mxu1 %vm608_vm2, %v6521_v43 }
 0x129   : > { %4949 = vmatmul.mubr.msk.bf16.gmra.mrb[8].mxu0 %vm608_vm2, %v7043_v63  ;;  %v7060_v63 = vld [vmem:[#allocation36_spill] sm:$0xff] }
 0x12a   : > { %4952 = vmatprep.mubr.msk.bf16.mxu0 %vm608_vm2, %v7044_v18  ;;  %v3187_v18 = vshll.u32 %v6240_v31, 16 }
 0x12f   : > { %4727 = vmatmul.mubr.msk.bf16.gmra.mrb[36].mxu1 %vm608_vm2, %v6534_v35 }
 0x130   : > { %4730 = vmatprep.mubr.msk.bf16.mxu1 %vm608_vm2, %v6537_v50 }
 0x131   : > { %4953 = vmatmul.mubr.msk.bf16.gmra.mrb[12].mxu0 %vm608_vm2, %v7045_v5  ;;  %v3189_v5 = vrot.slane %v3187_v18, 1  ;;  %v2084_v18 = vshrl.u32 %v6224_v44, 16 }
 0x132   : > { %4956 = vmatprep.mubr.msk.bf16.mxu0 %vm608_vm2, %v7046_v30  ;;  %v3194_v30 = vshll.u32 %v6249_v15, 16 }
 0x137   : > { %4731 = vmatmul.mubr.msk.bf16.gmra.mrb[40].mxu1 %vm608_vm2, %v6552_v46 }
 0x138   : > { %4734 = vmatprep.mubr.msk.bf16.mxu1 %vm608_vm2, %v6556_v17 }
 0x139   : > { %4957 = vmatmul.mubr.msk.bf16.gmra.mrb[16].mxu0 %vm608_vm2, %v7047_v54  ;;  %v7063_v54 = vld [vmem:[#allocation16_spill] sm:$0xff] }
 0x13a   : > { %4960 = vmatprep.mubr.msk.bf16.mxu0 %vm608_vm2, %v7048_v37  ;;  %v3190_v37 = vsel %vm411_vm1, %v6194_v6, %v3189_v5 }
 0x13f   : > { %4735 = vmatmul.mubr.msk.bf16.gmra.mrb[44].mxu1 %vm608_vm2, %v1237_v11  ;;  %v3198_v11 = vshrl.u32 %v6249_v15, 16 }
 0x140   : > { %4740 = vmatprep.mubr.msk.bf16.mxu1 %vm608_vm2, %v7049_v10  ;;  %v3201_v10 = vshll.u32 %v6468_v49, 16 }
 0x141   : > { %4961 = vmatmul.mubr.msk.bf16.gmra.mrb[20].mxu0 %vm608_vm2, %v7050_v23  ;;  %v7064_v23 = vld [vmem:[#allocation18_spill] sm:$0xff] }
 0x142   : > { %4964 = vmatprep.mubr.msk.bf16.mxu0 %vm608_vm2, %v7051_v40  ;;  %v6616_v40 = vld [vmem:[%s5736_s11 + $0xd8] ss:$0 sps:$4 sm:$0xff]   ;;  %s3967_s11 = sshll.u32 %s6798_s9, 4  ;;  %s6910_s11 = int_to_ptr.vmem [resolvable:$true] %s3967_s11 }
 0x143   : > { %s5548_s23 = scalar_lea.vmem %s6910_s11, 6144  ;;  %p5555_p1 = scmp.lt.s32.totalorder %s6910_s11, %s5553_s27 }
 0x144   : > { %p5549_p12 = scmp.ne.s32.totalorder %s6910_s11, %s5548_s23  ;;  %p5556_p2 = scmp.lt.s32.totalorder %s5554_s28, %s5548_s23 }
 0x146   : > { %p5550_p13 = pnand %p5549_p12, %p5691_p4  ;;  %p5557_p3 = por %p5556_p2, %p5555_p1 }
 0x147   : > { %4741 = vmatmul.mubr.msk.bf16.vlgmr.msra.gmra.mrb[0].mxu1 %vm608_vm2, %v7052_v39 }
 0x148   : > { %5039 = vmatpush3.bf16.msra.mxu1 %v7053_v9  ;;  %4744 = vmatprep.mubr.msk.bf16.mxu1 %vm608_vm2, %v7054_v12  ;;  %v3203_v9 = vrot.slane %v3201_v10, 1  ;;  %v3205_v12 = vshrl.u32 %v6468_v49, 16  ;;  %p5551_p0 = pneg %p5550_p13 }
 0x149   : > { %4965 = vmatmul.mubr.msk.bf16.gmra.mrb[24].mxu0 %vm608_vm2, %v7055_v13  ;;  %v3209_v13 = vshll.u32 %v6616_v40, 16 }
 0x14a   : > { %4968 = vmatprep.mubr.msk.bf16.mxu0 %vm608_vm2, %v7056_v53  ;;  %v7065_v53 = vld [vmem:[#allocation20_spill] sm:$0xff]  ;;  %p5558_p5 = pnand %p5557_p3, %p5551_p0 }
 0x14f   : > { %4745 = vmatmul.mubr.msk.bf16.gmra.mrb[4].mxu1 %vm608_vm2, %v7057_v3 }
 0x150   : > { %4748 = vmatprep.mubr.msk.bf16.mxu1 %vm608_vm2, %v7058_v20  ;;  %v3211_v20 = vrot.slane %v3209_v13, 1 }
 0x151   : > { %4969 = vmatmul.mubr.msk.bf16.gmra.mrb[28].mxu0 %vm608_vm2, %v7059_v34 }
 0x152   : > { %4972 = vmatprep.mubr.msk.bf16.mxu0 %vm608_vm2, %v7060_v63  ;;  %v2077_v63 = vshrl.u32 %v6211_v26, 16 }
 0x157   : > { %4749 = vmatmul.mubr.msk.bf16.gmra.mrb[8].mxu1 %vm608_vm2, %v7061_v22 }
 0x158   : > { %4752 = vmatprep.mubr.msk.bf16.mxu1 %vm608_vm2, %v7062_v7  ;;  %v2087_v7 = vshll.u32 %v6237_v59, 16 }
 0x159   : > { %4973 = vmatmul.mubr.msk.bf16.gmra.mrb[32].mxu0 %vm608_vm2, %v6155_v52  ;;  %v3196_v52 = vrot.slane %v3194_v30, 1 }
 0x15a   : > { %4976 = vmatprep.mubr.msk.bf16.mxu0 %vm608_vm2, %v6177_v27  ;;  %v3193_v27 = vor.u32 %v3191_v56, %v3189_v5  ;;  %v2089_v30 = vrot.slane %v2087_v7, 1  ;;  %v2091_v56 = vshrl.u32 %v6237_v59, 16 }
 0x15b   : > { %v3200_v39 = vor.u32 %v3198_v11, %v3196_v52  ;;  %v2101_v11 = vshll.u32 %v6264_v45, 16 }
 0x15c   : > { %v3197_v6 = vsel %vm411_vm1, %v3193_v27, %v3196_v52  ;;  %v2093_v10 = vor.u32 %v2091_v56, %v2089_v30  ;;  %v2105_v52 = vshrl.u32 %v6264_v45, 16 }
 0x15d   : > { %v3204_v3 = vsel %vm411_vm1, %v3200_v39, %v3203_v9  ;;  %v2112_v39 = vshrl.u32 %v6275_v0, 16 }
 0x15f   : > { %4753 = vmatmul.mubr.msk.bf16.gmra.mrb[12].mxu1 %vm608_vm2, %v7063_v54 }
 0x160   : > { %4756 = vmatprep.mubr.msk.bf16.mxu1 %vm608_vm2, %v7064_v23  ;;  %v2103_v23 = vrot.slane %v2101_v11, 1 }
 0x161   : > { %4977 = vmatmul.mubr.msk.bf16.gmra.mrb[36].mxu0 %vm608_vm2, %v6182_v14  ;;  %v3207_v14 = vor.u32 %v3205_v12, %v3203_v9  ;;  %v2115_v9 = vshll.u32 %v6282_v48, 16 }
 0x162   : > { %4980 = vmatprep.mubr.msk.bf16.mxu0 %vm608_vm2, %v3190_v37  ;;  %v2098_v37 = vshrl.u32 %v6257_v55, 16 }
 0x163   : > { %v3212_v34 = vsel %vm411_vm1, %v3207_v14, %v3211_v20  ;;  %v2117_v12 = vrot.slane %v2115_v9, 1  ;;  %v2126_v14 = vshrl.u32 %v6292_v51, 16  ;;  %v2129_v20 = vshll.u32 %v6298_v21, 16 }
 0x167   : > { %4757 = vmatmul.mubr.msk.bf16.gmra.mrb[16].mxu1 %vm608_vm2, %v7065_v53  ;;  %v2119_v53 = vshrl.u32 %v6282_v48, 16 }
 0x168   : > { %4760 = vmatprep.mubr.msk.bf16.mxu1 %vm608_vm2, %v5904_v47  ;;  %v2056_v47 = vshrl.u32 %v5937_v38, 16 }
 0x169   : > { %4981 = vmatmul.mubr.msk.bf16.gmra.mrb[40].mxu0 %vm608_vm2, %v3197_v6  ;;  %v2107_v6 = vor.u32 %v2105_v52, %v2103_v23 }
 0x16a   : > { %4984 = vmatprep.mubr.msk.bf16.mxu0 %vm608_vm2, %v3204_v3 }
 0x16f   : > { %4761 = vmatmul.mubr.msk.bf16.gmra.mrb[20].mxu1 %vm608_vm2, %v5918_v2  ;;  %v2059_v2 = vshll.u32 %v6190_v36, 16 }
 0x170   : > { %4764 = vmatprep.mubr.msk.bf16.mxu1 %vm608_vm2, %v5937_v38  ;;  %v2063_v38 = vshrl.u32 %v6190_v36, 16 }
 0x171   : > { %4985 = vmatmul.mubr.msk.bf16.gmra.mrb[44].mxu0 %vm608_vm2, %v3212_v34 }
 0x172   : > { %4990 = vmatprep.mubr.msk.bf16.mxu0 %vm608_vm2, %v6401_v1  ;;  %v7066_v1 = vld [vmem:[#allocation25_spill] sm:$0xff] }
 0x177   : > { %4765 = vmatmul.mubr.msk.bf16.gmra.mrb[24].mxu1 %vm608_vm2, %v6190_v36  ;;  %v2080_v36 = vshll.u32 %v6224_v44, 16 }
 0x178   : > { %4768 = vmatprep.mubr.msk.bf16.mxu1 %vm608_vm2, %v6205_v62 }
 0x179   : > { %4991 = vmatmul.mubr.msk.bf16.vlgmr.msra.gmra.mrb[0].mxu0 %vm608_vm2, %v6404_v24  ;;  %v2058_v24 = vor.u32 %v2056_v47, %v7066_v1  ;;  %v3507_v47 = vrot.slane %v6468_v49, 1  ;;  %v2133_v1 = vshrl.u32 %v6298_v21, 16 }
 0x17a   : > { %4994 = vmatprep.mubr.msk.bf16.mxu0 %vm608_vm2, %v6417_v8  ;;  %v2061_v8 = vrot.slane %v2059_v2, 1 }
 0x17f   : > { %4769 = vmatmul.mubr.msk.bf16.gmra.mrb[28].mxu1 %vm608_vm2, %v6211_v26 }
 0x180   : > { %4772 = vmatprep.mubr.msk.bf16.mxu1 %vm608_vm2, %v6224_v44 }
 0x181   : > { %4995 = vmatmul.mubr.msk.bf16.gmra.mrb[4].mxu0 %vm608_vm2, %v6420_v60  ;;  %v2066_v60 = vshll.u32 %v6205_v62, 16 }
 0x182   : > { %4998 = vmatprep.mubr.msk.bf16.mxu0 %vm608_vm2, %v6433_v33  ;;  %v2062_v33 = vsel %vm411_vm1, %v2058_v24, %v2061_v8 }
 0x187   : > { %4773 = vmatmul.mubr.msk.bf16.gmra.mrb[32].mxu1 %vm608_vm2, %v6237_v59  ;;  %v2108_v59 = vshll.u32 %v6275_v0, 16 }
 0x188   : > { %4776 = vmatprep.mubr.msk.bf16.mxu1 %vm608_vm2, %v6257_v55 }
 0x189   : > { %4999 = vmatmul.mubr.msk.bf16.gmra.mrb[8].mxu0 %vm608_vm2, %v6436_v25  ;;  %v2070_v25 = vshrl.u32 %v6205_v62, 16 }
 0x18a   : > { %5002 = vmatprep.mubr.msk.bf16.mxu0 %vm608_vm2, %v6449_v58  ;;  %v2073_v58 = vshll.u32 %v6211_v26, 16  ;;  %v2094_v26 = vshll.u32 %v6257_v55, 16 }
 0x18f   : > { %4777 = vmatmul.mubr.msk.bf16.gmra.mrb[36].mxu1 %vm608_vm2, %v6264_v45  ;;  %v3503_v45 = vrot.slane %v6240_v31, 1  ;;  %v2121_v31 = vor.u32 %v2119_v53, %v2117_v12 }
 0x190   : > { %4780 = vmatprep.mubr.msk.bf16.mxu1 %vm608_vm2, %v6275_v0  ;;  %v2122_v0 = vshll.u32 %v6292_v51, 16 }
 0x191   : > { %5003 = vmatmul.mubr.msk.bf16.gmra.mrb[12].mxu0 %vm608_vm2, %v6452_v61  ;;  %v2068_v61 = vrot.slane %v2066_v60, 1 }
 0x192   : > { %5006 = vmatprep.mubr.msk.bf16.mxu0 %vm608_vm2, %v6465_v16  ;;  %v2065_v16 = vor.u32 %v2063_v38, %v2061_v8 }
 0x194   : > { %v2069_v62 = vsel %vm411_vm1, %v2065_v16, %v2068_v61 }
 0x197   : > { %4781 = vmatmul.mubr.msk.bf16.gmra.mrb[40].mxu1 %vm608_vm2, %v6282_v48  ;;  %v2131_v48 = vrot.slane %v2129_v20, 1 }
 0x198   : > { %4784 = vmatprep.mubr.msk.bf16.mxu1 %vm608_vm2, %v6292_v51  ;;  %v3505_v51 = vrot.slane %v6249_v15, 1 }
 0x199   : > { %5007 = vmatmul.mubr.msk.bf16.gmra.mrb[16].mxu0 %vm608_vm2, %v6471_v32  ;;  %v2072_v32 = vor.u32 %v2070_v25, %v2068_v61  ;;  %v2135_v60 = vor.u32 %v2133_v1, %v2131_v48 }
 0x19a   : > { %5010 = vmatprep.mubr.msk.bf16.mxu0 %vm608_vm2, %v6484_v41  ;;  %v2075_v41 = vrot.slane %v2073_v58, 1  ;;  %v3506_v8 = vsel %vm1188_vm3, %v3503_v45, %v3505_v51 }
 0x19c   : > { %v2076_v22 = vsel %vm411_vm1, %v2072_v32, %v2075_v41  ;;  %v2079_v5 = vor.u32 %v2077_v63, %v2075_v41 }
 0x19f   : > { %4785 = vmatmul.mubr.msk.bf16.gmra.mrb[44].mxu1 %vm608_vm2, %v6298_v21  ;;  %v3509_v21 = vrot.slane %v6616_v40, 1 }
 0x1a0   : > { %4814 = vmatprep.mubr.msk.bf16.mxu1 %vm608_vm2, %v2062_v33 }
 0x1a1   : > { %5011 = vmatmul.mubr.msk.bf16.gmra.mrb[20].mxu0 %vm608_vm2, %v6487_v4  ;;  %v2082_v4 = vrot.slane %v2080_v36, 1  ;;  %v3510_v49 = vsel %vm1188_vm3, %v3507_v47, %v3509_v21 }
 0x1a2   : > { %5014 = vmatprep.mubr.msk.bf16.mxu0 %vm608_vm2, %v6502_v42 }
 0x1a3   : > { %v2086_v42 = vor.u32 %v2084_v18, %v2082_v4  ;;  %v2083_v44 = vsel %vm411_vm1, %v2079_v5, %v2082_v4 }
 0x1a5   : > { %v2090_v54 = vsel %vm411_vm1, %v2086_v42, %v2089_v30 }
 0x1a7   : > { %4815 = vmatmul.mubr.msk.bf16.vlgmr.msra.gmra.mrb[24].mxu1 %vm608_vm2, %v2069_v62 }
 0x1a8   : > { %4818 = vmatprep.mubr.msk.bf16.mxu1 %vm608_vm2, %v2076_v22 }
 0x1a9   : > { %5015 = vmatmul.mubr.msk.bf16.gmra.mrb[24].mxu0 %vm608_vm2, %v6505_v19  ;;  %v2096_v19 = vrot.slane %v2094_v26, 1 }
 0x1aa   : > { %5018 = vmatprep.mubr.msk.bf16.mxu0 %vm608_vm2, %v6518_v57 }
 0x1ab   : > { %v2100_v57 = vor.u32 %v2098_v37, %v2096_v19  ;;  %v2097_v55 = vsel %vm411_vm1, %v2093_v10, %v2096_v19  ;;  %v6792_v19 = vld [vmem:[%s6965_s2] ss:$0 sm:$0xff] }
 0x1ad   : > { %v2104_v27 = vsel %vm411_vm1, %v2100_v57, %v2103_v23 }
 0x1af   : > { %4819 = vmatmul.mubr.msk.bf16.gmra.mrb[28].mxu1 %vm608_vm2, %v2083_v44 }
 0x1b0   : > { %4822 = vmatprep.mubr.msk.bf16.mxu1 %vm608_vm2, %v2090_v54 }
 0x1b1   : > { %5019 = vmatmul.mubr.msk.bf16.gmra.mrb[28].mxu0 %vm608_vm2, %v6521_v43  ;;  %v2110_v43 = vrot.slane %v2108_v59, 1 }
 0x1b2   : > { %5022 = vmatprep.mubr.msk.bf16.mxu0 %vm608_vm2, %v6534_v35 }
 0x1b3   : > { %v2114_v35 = vor.u32 %v2112_v39, %v2110_v43  ;;  %v2111_v13 = vsel %vm411_vm1, %v2107_v6, %v2110_v43 }
 0x1b5   : > { %v2118_v3 = vsel %vm411_vm1, %v2114_v35, %v2117_v12 }
 0x1b7   : > { %4823 = vmatmul.mubr.msk.bf16.gmra.mrb[32].mxu1 %vm608_vm2, %v2097_v55 }
 0x1b8   : > { %4826 = vmatprep.mubr.msk.bf16.mxu1 %vm608_vm2, %v2104_v27 }
 0x1b9   : > { %5023 = vmatmul.mubr.msk.bf16.gmra.mrb[32].mxu0 %vm608_vm2, %v6537_v50  ;;  %v3504_v50 = vsel %vm1188_vm3, %v6547_v29, %v3503_v45  ;;  %v2137_v29 = vshll.u32 %v6307_v28, 16 }
 0x1ba   : > { %5026 = vmatprep.mubr.msk.bf16.mxu0 %vm608_vm2, %v6552_v46  ;;  %v2124_v46 = vrot.slane %v2122_v0, 1 }
 0x1bb   : > { %v2139_v15 = vrot.slane %v2137_v29, 1 }
 0x1bc   : > { %v2128_v34 = vor.u32 %v2126_v14, %v2124_v46  ;;  %v2125_v2 = vsel %vm411_vm1, %v2121_v31, %v2124_v46 }
 0x1bd   : > { %v2140_v28 = vsel %vm411_vm1, %v2135_v60, %v2139_v15 }
 0x1be   : > { %v2132_v24 = vsel %vm411_vm1, %v2128_v34, %v2131_v48 }
 0x1bf   : > { %4827 = vmatmul.mubr.msk.bf16.gmra.mrb[36].mxu1 %vm608_vm2, %v2111_v13 }
 0x1c0   : > { %4830 = vmatprep.mubr.msk.bf16.mxu1 %vm608_vm2, %v2118_v3 }
 0x1c1   : > { %5027 = vmatmul.mubr.msk.bf16.gmra.mrb[36].mxu0 %vm608_vm2, %v6556_v17  ;;  %v3508_v17 = vsel %vm1188_vm3, %v3505_v51, %v3507_v47 }
 0x1c2   : > { %5030 = vmatprep.mubr.msk.bf16.mxu0 %vm608_vm2, %v3504_v50 }
 0x1c7   : > { %4831 = vmatmul.mubr.msk.bf16.gmra.mrb[40].mxu1 %vm608_vm2, %v2125_v2 }
 0x1c8   : > { %4834 = vmatprep.mubr.msk.bf16.mxu1 %vm608_vm2, %v2132_v24 }
 0x1c9   : > { %5031 = vmatmul.mubr.msk.bf16.gmra.mrb[40].mxu0 %vm608_vm2, %v3506_v8 }
 0x1ca   : > { %5034 = vmatprep.mubr.msk.bf16.mxu0 %vm608_vm2, %v3508_v17 }
 0x1cf   : > { %4835 = vmatmul.mubr.msk.bf16.gmra.mrb[44].mxu1 %vm608_vm2, %v2140_v28 }
 0x1d1   : > { %5035 = vmatmul.mubr.msk.bf16.gmra.mrb[44].mxu0 %vm608_vm2, %v3510_v49 }
 0x21a   : > { %v4742_v38 = vpop.f32.mrb[0].mxu1 }
 0x21b   : > { %v1725_v33 = vpop.f32.mrb[1].mxu1 }
 0x21c   : > { %v4743_v25 = vpop.f32.mrb[2].mxu1 }
 0x21d   : > { %v1728_v58 = vpop.f32.mrb[3].mxu1 }
 0x222   : > { %v4746_v61 = vpop.f32.mrb[4].mxu1 }
 0x223   : > { %v1741_v16 = vpop.f32.mrb[5].mxu1 }
 0x224   : > { %v4747_v32 = vpop.f32.mrb[6].mxu1 }
 0x225   : > { %v1744_v41 = vpop.f32.mrb[7].mxu1 }
 0x22a   : > { %v4750_v36 = vpop.f32.mrb[8].mxu1 }
 0x22b   : > { %v1757_v62 = vpop.f32.mrb[9].mxu1 }
 0x22c   : > { %v6758_v40 = vpop.f32.mrb[10].mxu1 }
 0x22d   : > { %v6760_v63 = vpop.f32.mrb[11].mxu1 }
 0x232   : > { %v6762_v22 = vpop.f32.mrb[12].mxu1 }
 0x233   : > { %v6764_v18 = vpop.f32.mrb[13].mxu1 }
 0x234   : > { %v6766_v7 = vpop.f32.mrb[14].mxu1 }
 0x235   : > { %v6768_v4 = vpop.f32.mrb[15].mxu1 }
 0x23a   : > { %v6770_v5 = vpop.f32.mrb[16].mxu1 }
 0x23b   : > { %v6772_v42 = vpop.f32.mrb[17].mxu1 }
 0x23c   : > { %v6774_v30 = vpop.f32.mrb[18].mxu1 }
 0x23d   : > { %v6776_v26 = vpop.f32.mrb[19].mxu1 }
 0x242   : > { %v6778_v44 = vpop.f32.mrb[20].mxu1 }
 0x243   : > { %v6780_v56 = vpop.f32.mrb[21].mxu1 }
 0x244   : > { %v6782_v54 = vpop.f32.mrb[22].mxu1 }
 0x245   : > { %v6784_v37 = vpop.f32.mrb[23].mxu1 }
 0x24c   : > { %v4992_v11 = vpop.f32.mrb[0].mxu0 }
 0x24d   : > { %v5040_v10 = vadd.f32 %v4992_v11, %v4742_v38  ;;  %v3560_v57 = vpop.f32.mrb[1].mxu0 }
 0x24e   : > { %v5041_v23 = vadd.f32 %v3560_v57, %v1725_v33  ;;  %v4993_v59 = vpop.f32.mrb[2].mxu0 }
 0x24f   : > { %v3808_v55 = vadd.f32 %v5040_v10, %v6792_v19  ;;  %v5042_v52 = vadd.f32 %v4993_v59, %v4743_v25  ;;  %v3563_v27 = vpop.f32.mrb[3].mxu0 }
 0x250   : > { %v3806_v39 = vadd.f32 %v5041_v23, %v6792_v19  ;;  %v5043_v9 = vadd.f32 %v3563_v27, %v1728_v58 }
 0x251   : > { %v3856_v43 = vmax.f32 %v3808_v55, 0.0  ;;  %v3809_v6 = vadd.f32 %v5042_v52, %v6792_v19 }
 0x252   : > { %v3854_v35 = vmax.f32 %v3806_v39, 0.0  ;;  %v3807_v12 = vadd.f32 %v5043_v9, %v6792_v19 }
 0x253   : > { %3904 = vst [vmem:[%s6798_s9 + $0x10] sm:$0xff] %v3856_v43  ;;  %v3857_v45 = vmax.f32 %v3809_v6, 0.0 }
 0x254   : > { %3902 = vst [vmem:[%s6798_s9] sm:$0xff] %v3854_v35  ;;  %v3855_v0 = vmax.f32 %v3807_v12, 0.0  ;;  %v4996_v13 = vpop.f32.mrb[4].mxu0 }
 0x255   : > { %3905 = vst [vmem:[%s6798_s9 + $0x18] sm:$0xff] %v3857_v45  ;;  %v5044_v53 = vadd.f32 %v4996_v13, %v4746_v61  ;;  %v3576_v3 = vpop.f32.mrb[5].mxu0 }
 0x256   : > { %3903 = vst [vmem:[%s6798_s9 + $0x8] sm:$0xff] %v3855_v0  ;;  %v5045_v14 = vadd.f32 %v3576_v3, %v1741_v16  ;;  %v4997_v20 = vpop.f32.mrb[6].mxu0 }
 0x257   : > { %v3812_v50 = vadd.f32 %v5044_v53, %v6792_v19  ;;  %v5046_v46 = vadd.f32 %v4997_v20, %v4747_v32  ;;  %v3579_v31 = vpop.f32.mrb[7].mxu0 }
 0x258   : > { %v3810_v34 = vadd.f32 %v5045_v14, %v6792_v19  ;;  %v5047_v48 = vadd.f32 %v3579_v31, %v1744_v41 }
 0x259   : > { %v3860_v51 = vmax.f32 %v3812_v50, 0.0  ;;  %v3813_v47 = vadd.f32 %v5046_v46, %v6792_v19 }
 0x25a   : > { %v3858_v2 = vmax.f32 %v3810_v34, 0.0  ;;  %v3811_v1 = vadd.f32 %v5047_v48, %v6792_v19 }
 0x25b   : > { %3908 = vst [vmem:[%s6798_s9 + $0x30] sm:$0xff] %v3860_v51  ;;  %v3861_v29 = vmax.f32 %v3813_v47, 0.0 }
 0x25c   : > { %3906 = vst [vmem:[%s6798_s9 + $0x20] sm:$0xff] %v3858_v2  ;;  %v3859_v24 = vmax.f32 %v3811_v1, 0.0  ;;  %v5000_v8 = vpop.f32.mrb[8].mxu0 }
 0x25d   : > { %3909 = vst [vmem:[%s6798_s9 + $0x38] sm:$0xff] %v3861_v29  ;;  %v5048_v17 = vadd.f32 %v5000_v8, %v4750_v36  ;;  %v3592_v60 = vpop.f32.mrb[9].mxu0 }
 0x25e   : > { %3907 = vst [vmem:[%s6798_s9 + $0x28] sm:$0xff] %v3859_v24  ;;  %v5049_v15 = vadd.f32 %v3592_v60, %v1757_v62  ;;  %v5001_v21 = vpop.f32.mrb[10].mxu0 }
 0x25f   : > { %v3816_v28 = vadd.f32 %v5048_v17, %v6792_v19  ;;  %v5050_v49 = vadd.f32 %v5001_v21, %v6758_v40  ;;  %v3595_v38 = vpop.f32.mrb[11].mxu0 }
 0x260   : > { %v3814_v33 = vadd.f32 %v5049_v15, %v6792_v19  ;;  %v5051_v25 = vadd.f32 %v3595_v38, %v6760_v63 }
 0x261   : > { %v3864_v58 = vmax.f32 %v3816_v28, 0.0  ;;  %v3817_v61 = vadd.f32 %v5050_v49, %v6792_v19 }
 0x262   : > { %v3862_v16 = vmax.f32 %v3814_v33, 0.0  ;;  %v3815_v32 = vadd.f32 %v5051_v25, %v6792_v19 }
 0x263   : > { %3912 = vst [vmem:[%s6798_s9 + $0x50] sm:$0xff] %v3864_v58  ;;  %v3865_v41 = vmax.f32 %v3817_v61, 0.0 }
 0x264   : > { %3910 = vst [vmem:[%s6798_s9 + $0x40] sm:$0xff] %v3862_v16  ;;  %v3863_v36 = vmax.f32 %v3815_v32, 0.0  ;;  %v5004_v62 = vpop.f32.mrb[12].mxu0 }
 0x265   : > { %3913 = vst [vmem:[%s6798_s9 + $0x58] sm:$0xff] %v3865_v41  ;;  %v5052_v40 = vadd.f32 %v5004_v62, %v6762_v22  ;;  %v3608_v11 = vpop.f32.mrb[13].mxu0 }
 0x266   : > { %3911 = vst [vmem:[%s6798_s9 + $0x48] sm:$0xff] %v3863_v36  ;;  %v5053_v63 = vadd.f32 %v3608_v11, %v6764_v18  ;;  %v5005_v10 = vpop.f32.mrb[14].mxu0 }
 0x267   : > { %v3820_v57 = vadd.f32 %v5052_v40, %v6792_v19  ;;  %v5054_v23 = vadd.f32 %v5005_v10, %v6766_v7  ;;  %v3611_v59 = vpop.f32.mrb[15].mxu0 }
 0x268   : > { %v3818_v55 = vadd.f32 %v5053_v63, %v6792_v19  ;;  %v5055_v52 = vadd.f32 %v3611_v59, %v6768_v4 }
 0x269   : > { %v3868_v27 = vmax.f32 %v3820_v57, 0.0  ;;  %v3821_v22 = vadd.f32 %v5054_v23, %v6792_v19 }
 0x26a   : > { %v3866_v39 = vmax.f32 %v3818_v55, 0.0  ;;  %v3819_v9 = vadd.f32 %v5055_v52, %v6792_v19 }
 0x26b   : > { %3916 = vst [vmem:[%s6798_s9 + $0x70] sm:$0xff] %v3868_v27  ;;  %v3869_v18 = vmax.f32 %v3821_v22, 0.0 }
 0x26c   : > { %3914 = vst [vmem:[%s6798_s9 + $0x60] sm:$0xff] %v3866_v39  ;;  %v3867_v43 = vmax.f32 %v3819_v9, 0.0  ;;  %v5008_v6 = vpop.f32.mrb[16].mxu0 }
 0x26d   : > { %3917 = vst [vmem:[%s6798_s9 + $0x78] sm:$0xff] %v3869_v18  ;;  %v5056_v7 = vadd.f32 %v5008_v6, %v6770_v5  ;;  %v3624_v35 = vpop.f32.mrb[17].mxu0 }
 0x26e   : > { %3915 = vst [vmem:[%s6798_s9 + $0x68] sm:$0xff] %v3867_v43  ;;  %v5057_v4 = vadd.f32 %v3624_v35, %v6772_v42  ;;  %v5009_v12 = vpop.f32.mrb[18].mxu0 }
 0x26f   : > { %v3824_v45 = vadd.f32 %v5056_v7, %v6792_v19  ;;  %v5058_v0 = vadd.f32 %v5009_v12, %v6774_v30  ;;  %v3627_v13 = vpop.f32.mrb[19].mxu0 }
 0x270   : > { %v3822_v53 = vadd.f32 %v5057_v4, %v6792_v19  ;;  %v5059_v3 = vadd.f32 %v3627_v13, %v6776_v26 }
 0x271   : > { %v3872_v14 = vmax.f32 %v3824_v45, 0.0  ;;  %v3825_v5 = vadd.f32 %v5058_v0, %v6792_v19 }
 0x272   : > { %v3870_v20 = vmax.f32 %v3822_v53, 0.0  ;;  %v3823_v50 = vadd.f32 %v5059_v3, %v6792_v19 }
 0x273   : > { %3920 = vst [vmem:[%s6798_s9 + $0x90] sm:$0xff] %v3872_v14  ;;  %v3873_v42 = vmax.f32 %v3825_v5, 0.0 }
 0x274   : > { %3918 = vst [vmem:[%s6798_s9 + $0x80] sm:$0xff] %v3870_v20  ;;  %v3871_v46 = vmax.f32 %v3823_v50, 0.0  ;;  %v5012_v31 = vpop.f32.mrb[20].mxu0 }
 0x275   : > { %3921 = vst [vmem:[%s6798_s9 + $0x98] sm:$0xff] %v3873_v42  ;;  %v5060_v30 = vadd.f32 %v5012_v31, %v6778_v44  ;;  %v3640_v34 = vpop.f32.mrb[21].mxu0 }
 0x276   : > { %3919 = vst [vmem:[%s6798_s9 + $0x88] sm:$0xff] %v3871_v46  ;;  %v5061_v26 = vadd.f32 %v3640_v34, %v6780_v56  ;;  %v5013_v48 = vpop.f32.mrb[22].mxu0 }
 0x277   : > { %v3828_v51 = vadd.f32 %v5060_v30, %v6792_v19  ;;  %v5062_v47 = vadd.f32 %v5013_v48, %v6782_v54  ;;  %v3643_v2 = vpop.f32.mrb[23].mxu0 }
 0x278   : > { %v3826_v1 = vadd.f32 %v5061_v26, %v6792_v19  ;;  %v5063_v29 = vadd.f32 %v3643_v2, %v6784_v37 }
 0x279   : > { %v3876_v24 = vmax.f32 %v3828_v51, 0.0  ;;  %v3829_v44 = vadd.f32 %v5062_v47, %v6792_v19 }
 0x27a   : > { %v3874_v8 = vmax.f32 %v3826_v1, 0.0  ;;  %v3827_v17 = vadd.f32 %v5063_v29, %v6792_v19  ;;  %v4816_v60 = vpop.f32.mrb[24].mxu1 }
 0x27b   : > { %3924 = vst [vmem:[%s6798_s9 + $0xb0] sm:$0xff] %v3876_v24  ;;  %v3877_v56 = vmax.f32 %v3829_v44, 0.0  ;;  %v2346_v15 = vpop.f32.mrb[25].mxu1 }
 0x27c   : > { %3922 = vst [vmem:[%s6798_s9 + $0xa0] sm:$0xff] %v3874_v8  ;;  %v3875_v21 = vmax.f32 %v3827_v17, 0.0  ;;  %v5016_v54 = vpop.f32.mrb[24].mxu0  ;;  %v4817_v28 = vpop.f32.mrb[26].mxu1 }
 0x27d   : > { %3925 = vst [vmem:[%s6798_s9 + $0xb8] sm:$0xff] %v3877_v56  ;;  %v5064_v49 = vadd.f32 %v5016_v54, %v4816_v60  ;;  %v3656_v38 = vpop.f32.mrb[25].mxu0  ;;  %v2349_v37 = vpop.f32.mrb[27].mxu1 }
 0x27e   : > { %3923 = vst [vmem:[%s6798_s9 + $0xa8] sm:$0xff] %v3875_v21  ;;  %v5065_v33 = vadd.f32 %v3656_v38, %v2346_v15  ;;  %v5017_v25 = vpop.f32.mrb[26].mxu0 }
 0x27f   : > { %v3832_v58 = vadd.f32 %v5064_v49, %v6792_v19  ;;  %v5066_v61 = vadd.f32 %v5017_v25, %v4817_v28  ;;  %v3659_v16 = vpop.f32.mrb[27].mxu0 }
 0x280   : > { %v3830_v32 = vadd.f32 %v5065_v33, %v6792_v19  ;;  %v5067_v41 = vadd.f32 %v3659_v16, %v2349_v37 }
 0x281   : > { %v3880_v36 = vmax.f32 %v3832_v58, 0.0  ;;  %v3833_v62 = vadd.f32 %v5066_v61, %v6792_v19 }
 0x282   : > { %v3878_v40 = vmax.f32 %v3830_v32, 0.0  ;;  %v3831_v11 = vadd.f32 %v5067_v41, %v6792_v19  ;;  %v4820_v63 = vpop.f32.mrb[28].mxu1 }
 0x283   : > { %3928 = vst [vmem:[%s6798_s9 + $0xd0] sm:$0xff] %v3880_v36  ;;  %v3881_v10 = vmax.f32 %v3833_v62, 0.0  ;;  %v2362_v57 = vpop.f32.mrb[29].mxu1 }
 0x284   : > { %3926 = vst [vmem:[%s6798_s9 + $0xc0] sm:$0xff] %v3878_v40  ;;  %v3879_v23 = vmax.f32 %v3831_v11, 0.0  ;;  %v5020_v59 = vpop.f32.mrb[28].mxu0  ;;  %v4821_v55 = vpop.f32.mrb[30].mxu1 }
 0x285   : > { %3929 = vst [vmem:[%s6798_s9 + $0xd8] sm:$0xff] %v3881_v10  ;;  %v5068_v52 = vadd.f32 %v5020_v59, %v4820_v63  ;;  %v3672_v27 = vpop.f32.mrb[29].mxu0  ;;  %v2365_v22 = vpop.f32.mrb[31].mxu1 }
 0x286   : > { %3927 = vst [vmem:[%s6798_s9 + $0xc8] sm:$0xff] %v3879_v23  ;;  %v5069_v39 = vadd.f32 %v3672_v27, %v2362_v57  ;;  %v5021_v9 = vpop.f32.mrb[30].mxu0 }
 0x287   : > { %v3836_v18 = vadd.f32 %v5068_v52, %v6792_v19  ;;  %v5070_v43 = vadd.f32 %v5021_v9, %v4821_v55  ;;  %v3675_v6 = vpop.f32.mrb[31].mxu0 }
 0x288   : > { %v3834_v7 = vadd.f32 %v5069_v39, %v6792_v19  ;;  %v5071_v35 = vadd.f32 %v3675_v6, %v2365_v22 }
 0x289   : > { %v3884_v4 = vmax.f32 %v3836_v18, 0.0  ;;  %v3837_v12 = vadd.f32 %v5070_v43, %v6792_v19 }
 0x28a   : > { %v3882_v45 = vmax.f32 %v3834_v7, 0.0  ;;  %v3835_v0 = vadd.f32 %v5071_v35, %v6792_v19  ;;  %v4824_v13 = vpop.f32.mrb[32].mxu1 }
 0x28b   : > { %3932 = vst [vmem:[%s6798_s9 + $0xf0] sm:$0xff] %v3884_v4  ;;  %v3885_v53 = vmax.f32 %v3837_v12, 0.0  ;;  %v2378_v3 = vpop.f32.mrb[33].mxu1 }
 0x28c   : > { %3930 = vst [vmem:[%s6798_s9 + $0xe0] sm:$0xff] %v3882_v45  ;;  %v3883_v14 = vmax.f32 %v3835_v0, 0.0  ;;  %v5024_v5 = vpop.f32.mrb[32].mxu0  ;;  %v4825_v20 = vpop.f32.mrb[34].mxu1 }
 0x28d   : > { %3933 = vst [vmem:[%s6798_s9 + $0xf8] sm:$0xff] %v3885_v53  ;;  %v5072_v50 = vadd.f32 %v5024_v5, %v4824_v13  ;;  %v3688_v42 = vpop.f32.mrb[33].mxu0  ;;  %v2381_v46 = vpop.f32.mrb[35].mxu1 }
 0x28e   : > { %3931 = vst [vmem:[%s6798_s9 + $0xe8] sm:$0xff] %v3883_v14  ;;  %v5073_v31 = vadd.f32 %v3688_v42, %v2378_v3  ;;  %v5025_v30 = vpop.f32.mrb[34].mxu0 }
 0x28f   : > { %v3840_v34 = vadd.f32 %v5072_v50, %v6792_v19  ;;  %v5074_v26 = vadd.f32 %v5025_v30, %v4825_v20  ;;  %v3691_v48 = vpop.f32.mrb[35].mxu0 }
 0x290   : > { %v3838_v51 = vadd.f32 %v5073_v31, %v6792_v19  ;;  %v5075_v47 = vadd.f32 %v3691_v48, %v2381_v46 }
 0x291   : > { %v3888_v2 = vmax.f32 %v3840_v34, 0.0  ;;  %v3841_v1 = vadd.f32 %v5074_v26, %v6792_v19 }
 0x292   : > { %v3886_v29 = vmax.f32 %v3838_v51, 0.0  ;;  %v3839_v24 = vadd.f32 %v5075_v47, %v6792_v19  ;;  %v4828_v44 = vpop.f32.mrb[36].mxu1 }
 0x293   : > { %3936 = vst [vmem:[%s6798_s9 + $0x110] sm:$0xff] %v3888_v2  ;;  %v3889_v8 = vmax.f32 %v3841_v1, 0.0  ;;  %v2394_v17 = vpop.f32.mrb[37].mxu1 }
 0x294   : > { %3934 = vst [vmem:[%s6798_s9 + $0x100] sm:$0xff] %v3886_v29  ;;  %v3887_v60 = vmax.f32 %v3839_v24, 0.0  ;;  %v5028_v56 = vpop.f32.mrb[36].mxu0  ;;  %v4829_v15 = vpop.f32.mrb[38].mxu1 }
 0x295   : > { %3937 = vst [vmem:[%s6798_s9 + $0x118] sm:$0xff] %v3889_v8  ;;  %v5076_v21 = vadd.f32 %v5028_v56, %v4828_v44  ;;  %v3704_v54 = vpop.f32.mrb[37].mxu0  ;;  %v2397_v28 = vpop.f32.mrb[39].mxu1 }
 0x296   : > { %3935 = vst [vmem:[%s6798_s9 + $0x108] sm:$0xff] %v3887_v60  ;;  %v5077_v49 = vadd.f32 %v3704_v54, %v2394_v17  ;;  %v5029_v38 = vpop.f32.mrb[38].mxu0 }
 0x297   : > { %v3844_v37 = vadd.f32 %v5076_v21, %v6792_v19  ;;  %v5078_v33 = vadd.f32 %v5029_v38, %v4829_v15  ;;  %v3707_v25 = vpop.f32.mrb[39].mxu0 }
 0x298   : > { %v3842_v58 = vadd.f32 %v5077_v49, %v6792_v19  ;;  %v5079_v61 = vadd.f32 %v3707_v25, %v2397_v28 }
 0x299   : > { %v3892_v16 = vmax.f32 %v3844_v37, 0.0  ;;  %v3845_v32 = vadd.f32 %v5078_v33, %v6792_v19 }
 0x29a   : > { %v3890_v41 = vmax.f32 %v3842_v58, 0.0  ;;  %v3843_v36 = vadd.f32 %v5079_v61, %v6792_v19  ;;  %v4832_v62 = vpop.f32.mrb[40].mxu1 }
 0x29b   : > { %3940 = vst [vmem:[%s6798_s9 + $0x130] sm:$0xff] %v3892_v16  ;;  %v3893_v40 = vmax.f32 %v3845_v32, 0.0  ;;  %v2410_v11 = vpop.f32.mrb[41].mxu1 }
 0x29c   : > { %3938 = vst [vmem:[%s6798_s9 + $0x120] sm:$0xff] %v3890_v41  ;;  %v3891_v63 = vmax.f32 %v3843_v36, 0.0  ;;  %v5032_v10 = vpop.f32.mrb[40].mxu0  ;;  %v4833_v57 = vpop.f32.mrb[42].mxu1 }
 0x29d   : > { %3941 = vst [vmem:[%s6798_s9 + $0x138] sm:$0xff] %v3893_v40  ;;  %v5080_v23 = vadd.f32 %v5032_v10, %v4832_v62  ;;  %v3720_v59 = vpop.f32.mrb[41].mxu0  ;;  %v2413_v55 = vpop.f32.mrb[43].mxu1 }
 0x29e   : > { %3939 = vst [vmem:[%s6798_s9 + $0x128] sm:$0xff] %v3891_v63  ;;  %v5081_v52 = vadd.f32 %v3720_v59, %v2410_v11  ;;  %v5033_v27 = vpop.f32.mrb[42].mxu0 }
 0x29f   : > { %v3848_v22 = vadd.f32 %v5080_v23, %v6792_v19  ;;  %v5082_v39 = vadd.f32 %v5033_v27, %v4833_v57  ;;  %v3723_v9 = vpop.f32.mrb[43].mxu0 }
 0x2a0   : > { %v3846_v18 = vadd.f32 %v5081_v52, %v6792_v19  ;;  %v5083_v43 = vadd.f32 %v3723_v9, %v2413_v55 }
 0x2a1   : > { %v3896_v6 = vmax.f32 %v3848_v22, 0.0  ;;  %v3849_v7 = vadd.f32 %v5082_v39, %v6792_v19 }
 0x2a2   : > { %v3894_v35 = vmax.f32 %v3846_v18, 0.0  ;;  %v3847_v4 = vadd.f32 %v5083_v43, %v6792_v19  ;;  %v4836_v12 = vpop.f32.mrb[44].mxu1 }
 0x2a3   : > { %3944 = vst [vmem:[%s6798_s9 + $0x150] sm:$0xff] %v3896_v6  ;;  %v3897_v45 = vmax.f32 %v3849_v7, 0.0  ;;  %v2426_v0 = vpop.f32.mrb[45].mxu1 }
 0x2a4   : > { %3942 = vst [vmem:[%s6798_s9 + $0x140] sm:$0xff] %v3894_v35  ;;  %v3895_v13 = vmax.f32 %v3847_v4, 0.0  ;;  %v5036_v53 = vpop.f32.mrb[44].mxu0  ;;  %v4837_v3 = vpop.f32.mrb[46].mxu1 }
 0x2a5   : > { %3945 = vst [vmem:[%s6798_s9 + $0x158] sm:$0xff] %v3897_v45  ;;  %v5084_v14 = vadd.f32 %v5036_v53, %v4836_v12  ;;  %v3736_v5 = vpop.f32.mrb[45].mxu0  ;;  %v2429_v20 = vpop.f32.mrb[47].mxu1 }
 0x2a6   : > { %3943 = vst [vmem:[%s6798_s9 + $0x148] sm:$0xff] %v3895_v13  ;;  %v5085_v50 = vadd.f32 %v3736_v5, %v2426_v0  ;;  %v5037_v42 = vpop.f32.mrb[46].mxu0 }
 0x2a7   : > { %v3852_v46 = vadd.f32 %v5084_v14, %v6792_v19  ;;  %v5086_v31 = vadd.f32 %v5037_v42, %v4837_v3  ;;  %v3739_v30 = vpop.f32.mrb[47].mxu0 }
 0x2a8   : > { %v3850_v34 = vadd.f32 %v5085_v50, %v6792_v19  ;;  %v5087_v26 = vadd.f32 %v3739_v30, %v2429_v20 }
 0x2a9   : > { %v3900_v48 = vmax.f32 %v3852_v46, 0.0  ;;  %v3853_v51 = vadd.f32 %v5086_v31, %v6792_v19 }
 0x2aa   : > { %v3898_v47 = vmax.f32 %v3850_v34, 0.0  ;;  %v3851_v2 = vadd.f32 %v5087_v26, %v6792_v19 }
 0x2ab   : > { %3948 = vst [vmem:[%s6798_s9 + $0x170] sm:$0xff] %v3900_v48  ;;  %v3901_v1 = vmax.f32 %v3853_v51, 0.0 }
 0x2ac   : > { %3946 = vst [vmem:[%s6798_s9 + $0x160] sm:$0xff] %v3898_v47  ;;  %v3899_v29 = vmax.f32 %v3851_v2, 0.0 }
 0x2ad   : > { %3949 = vst [vmem:[%s6798_s9 + $0x178] sm:$0xff] %v3901_v1 }
 0x2ae   : > { %3947 = vst [vmem:[%s6798_s9 + $0x168] sm:$0xff] %v3899_v29 }
 0x2af   : > { %5561 = shalt.err (!%p5558_p5)
}
 0x2b0   : > { %s5562_s29 = scalar_lea.hbm %s6908_s21, 6144  ;;  %s5566_s5 = scalar_lea.hbm %s6966_s3, 12288 }
 0x2b1   : > { %p5563_p6 = scmp.ne.s32.totalorder %s6908_s21, %s5562_s29  ;;  %p5567_p10 = scmp.lt.u32.totalorder %s6908_s21, %s6966_s3 }
 0x2b2   : > { %p5568_p11 = scmp.lt.u32.totalorder %s5566_s5, %s5562_s29  ;;  %p5570_p13 = scmp.lt.u32.totalorder %s5562_s29, %s6908_s21 }
 0x2b3   : > { %p5564_p7 = pnand %p5563_p6, %p5691_p4 }
 0x2b4   : > { %p5569_p12 = por %p5568_p11, %p5567_p10 }
 0x2b5   : > { %p5565_p9 = pneg %p5564_p7 }
 0x2b6   : > { %p5571_p0 = por %p5570_p13, %p5569_p12 }
 0x2b8   : > { %p5572_p1 = pnand %p5571_p0, %p5565_p9 }
 0x2ba   : > { %5575 = shalt.err (!%p5572_p1)
}
 0x2bb   : > { %s5629_s8 = smov 128   ;;  %s5630_s9 = smov 8  }
 0x2bc   : > { %5437 = dma.vmem_to_hbm [thread:$0]  (%p5691_p4), %s6910_s11, 6144, %s6908_s21, %s6917_s15, %s5629_s8, %s5629_s8, %s5630_s9  }
 0x2bd PF: > { %p5443_p2 = scmp.ge.s32.totalorder %s5626_s17, 2  ;;  %s3982_s10 = sand.u32 1, %s5606_s12  }
 0x2be   : > { %s3983_s18 = scalar_lea.sflag [#allocation3], %s3982_s10 }
 0x2bf   : > { %p5440_p3 = pnand %p5443_p2, %p5698_p8 }
 0x2c1   : > { %5601 = dma.done.wait (!%p5440_p3), %s3983_s18, 6144  }
 0x2c2   : > { %5603 = vsyncadd (!%p5440_p3), %s3983_s18, 4294961152  ;;  %s16_s17 = sadd.s32 1, %s5626_s17   ;;  %s7067_s12 = smov %s5610_s13 }
 0x2c3   : > { %p13_p5 = scmp.ge.s32.totalorder %s16_s17, 4   ;;  %s7068_s13 = smov %s5614_s14 }
 0x2c4   : > { %s7069_s14 = smov %s5704_s25  ;;  %s7070_s15 = smov %s5622_s16 }
 0x2c5   : > { %s7071_s16 = smov %s7073_s20  ;;  %15 = sbr.rel (!%p13_p5) target bundleno = 4 (0x4), region = 82 }
 0x2cc   :  { %3988 = vsyncpa [#allocation3], 1 }
 0x2cd   :  { %3990 = vsyncpa [#allocation3 + $0x1], 1 }

</bundles_post_ra>
